<compile_context>
chip_gen: v5e
topology: v5e:2x2
jax: 0.10.0
libtpu: 0.0.40
codegen_flags: <defaults>
</compile_context>

<pallas_src>
import functools

import jax
import jax.numpy as jnp
from jax.experimental import pallas as pl
from jax.experimental.pallas import tpu as pltpu

BN_EPS = 1e-5


def encoder_kernel(feat_ref, w1_ref, gamma_ref, beta_ref, w2_ref, b2_ref,
                   y_ref, z_ref, acc_ref, *,
                   inv_s, inv_b, seq_len, tile_s, needs_mask):
    s = pl.program_id(1)                       # sequence (reduction) axis

    @pl.when(s == 0)
    def _init():
        acc_ref[...] = jnp.zeros_like(acc_ref)

    x = feat_ref[...]                          # (B, tile_s, D), streamed dtype
    if needs_mask:                             # static: only if S % tile_s != 0
        pos = s * tile_s + jax.lax.broadcasted_iota(jnp.int32, x.shape, 1)
        x = jnp.where(pos < seq_len, x, jnp.zeros_like(x))
    # Accumulate straight into f32 (no explicit astype -> no full f32 copy of
    # the tile materialised before the reduce).
    acc_ref[...] += jnp.sum(x, axis=1, dtype=jnp.float32)

    @pl.when(s == pl.num_programs(1) - 1)
    def _finalize():
        # AdaptiveAvgPool1d(1): mean over the full sequence axis.
        y = acc_ref[...] * inv_s                              # (B, D) f32
        y_ref[...] = y.astype(y_ref.dtype)

        # Linear(D -> H, bias=False), f32 operands (torch-f32 fidelity).
        h = jnp.dot(y, w1_ref[...], preferred_element_type=jnp.float32)

        # BatchNorm1d (training-mode batch stats) folded into one FMA.
        mu = jnp.sum(h, axis=0, keepdims=True) * inv_b        # (1, H)
        d = h - mu
        var = jnp.sum(d * d, axis=0, keepdims=True) * inv_b   # (1, H) biased
        scale = gamma_ref[...] * jax.lax.rsqrt(var + BN_EPS)
        shift = beta_ref[...] - mu * scale

        # ReLU.
        h_act = jnp.maximum(h * scale + shift, 0.0)           # (B, H) f32

        # Linear(H -> O, bias=True).
        z = jnp.dot(h_act, w2_ref[...],
                    preferred_element_type=jnp.float32) + b2_ref[...]
        z_ref[...] = z.astype(z_ref.dtype)


def _vmem_capacity_bytes():
    """Physical per-core VMEM; conservative fallback (v7x = 64 MiB)."""
    try:
        cap = getattr(pltpu.get_tpu_info(), "vmem_capacity_bytes", None)
        if cap:
            return int(cap)
    except Exception:
        pass
    return 64 << 20


def _sublane_quantum(itemsize):
    # native sublane tile per dtype width: f32 -> 8, bf16 -> 16, int8/fp8 -> 32
    return {4: 8, 2: 16, 1: 32}.get(itemsize, 8)


def _pick_tile_s(B, S, D, itemsize, tile_budget_bytes):
    """Largest sequence tile whose double-buffered feat blocks fit the budget.
    Returns S (single block) when the whole sequence fits; otherwise a
    multiple of the dtype's sublane quantum.  tile_s does NOT have to divide
    S: the grid uses cdiv and the kernel masks the ragged last tile."""
    q = _sublane_quantum(itemsize)
    per_row = 2 * B * D * itemsize             # x2: double-buffered feat block
    max_rows = max(tile_budget_bytes // per_row, 1)
    if S <= max_rows:
        return S
    return max((max_rows // q) * q, q)


def encoder_forward(feat, w1, gamma, beta, w2, b2, *, max_tile_s=None):
    """Fused pooler + projector head.

    feat : (B, S, D) or (G, B, S, D).  The leading G axis packs independent
           work units (e.g. the MoCo query/key branches), each with its own
           BatchNorm statistics; it is mapped to a 'parallel' grid axis so
           v7x's second TensorCore is used.  Pass bf16 features to halve the
           HBM stream; the in-kernel accumulator is f32 regardless.
    Returns (y, z) in f32 with the same leading-branch layout as feat.
    """
    squeeze = feat.ndim == 3
    if squeeze:
        feat = feat[None]
    G, B, S, D = feat.shape
    H = w1.shape[1]
    O = w2.shape[1]

    w1f = w1.astype(jnp.float32)
    w2f = w2.astype(jnp.float32)
    gamma2 = gamma.reshape(1, H).astype(jnp.float32)
    beta2 = beta.reshape(1, H).astype(jnp.float32)
    b22 = b2.reshape(1, O).astype(jnp.float32)

    # ---- Generation-aware VMEM budget (honest about double-buffering) ----
    phys = _vmem_capacity_bytes()                    # 128 MiB v5e/v6e, 64 MiB v7x
    vmem_limit = int(min(phys * 3 // 4, 96 << 20))   # 96 MiB v5e/v6e, 48 MiB v7x
    # Constant-index inputs and output blocks are still double-buffered by the
    # default pipeliner -> count them twice; accumulator scratch once.
    param_bytes = (w1f.size + w2f.size + gamma2.size + beta2.size + b22.size) * 4
    out_bytes = (B * D + B * O) * 4
    resident_bytes = 2 * param_bytes + 2 * out_bytes + B * D * 4
    margin = 2 << 20                                 # compiler-internal scratch
    tile_budget = max(vmem_limit - resident_bytes - margin, 0)

    tile_s = _pick_tile_s(B, S, D, feat.dtype.itemsize, tile_budget)
    if max_tile_s is not None:
        q = _sublane_quantum(feat.dtype.itemsize)
        tile_s = min(tile_s, max(q, (max_tile_s // q) * q))
    num_s = pl.cdiv(S, tile_s)
    needs_mask = (S % tile_s) != 0

    kernel = functools.partial(
        encoder_kernel, inv_s=1.0 / S, inv_b=1.0 / B,
        seq_len=S, tile_s=tile_s, needs_mask=needs_mask)

    y, z = pl.pallas_call(
        kernel,
        out_shape=(
            jax.ShapeDtypeStruct((G, B, D), jnp.float32),
            jax.ShapeDtypeStruct((G, B, O), jnp.float32),
        ),
        grid_spec=pltpu.PrefetchScalarGridSpec(
            num_scalar_prefetch=0,
            grid=(G, num_s),
            in_specs=[
                pl.BlockSpec((None, B, tile_s, D), lambda g, s: (g, 0, s, 0)),
                pl.BlockSpec((D, H), lambda g, s: (0, 0)),   # w1   (resident)
                pl.BlockSpec((1, H), lambda g, s: (0, 0)),   # gamma
                pl.BlockSpec((1, H), lambda g, s: (0, 0)),   # beta
                pl.BlockSpec((H, O), lambda g, s: (0, 0)),   # w2   (resident)
                pl.BlockSpec((1, O), lambda g, s: (0, 0)),   # b2
            ],
            out_specs=(
                pl.BlockSpec((None, B, D), lambda g, s: (g, 0, 0)),  # y
                pl.BlockSpec((None, B, O), lambda g, s: (g, 0, 0)),  # z
            ),
            scratch_shapes=[pltpu.VMEM((B, D), jnp.float32)],        # pooled sum
        ),
        compiler_params=pltpu.CompilerParams(
            dimension_semantics=("parallel", "arbitrary"),
            vmem_limit_bytes=vmem_limit,
        ),
    )(feat, w1f, gamma2, beta2, w2f, b22)

    if squeeze:
        y, z = y[0], z[0]
    return y, z


def reference_forward(feat, w1, gamma, beta, w2, b2):
    """Pure-JAX reference mirroring the module semantics (f32 matmuls)."""
    y = jnp.mean(feat.astype(jnp.float32), axis=1)
    h = jnp.dot(y, w1, precision=jax.lax.Precision.HIGHEST)
    mu = jnp.mean(h, axis=0, keepdims=True)
    var = jnp.mean((h - mu) ** 2, axis=0, keepdims=True)
    h = (h - mu) * jax.lax.rsqrt(var + BN_EPS)
    h = h * gamma.reshape(1, -1) + beta.reshape(1, -1)
    h = jnp.maximum(h, 0.0)
    z = jnp.dot(h, w2, precision=jax.lax.Precision.HIGHEST) + b2.reshape(1, -1)
    return y, z


if __name__ == "__main__":
    # encoderModel(encoder='vit', out_dim=128, hidden_size=512) -> dim = 256
    G, B, S = 2, 8, 24      # G=2: the two MoCo branches (query/key) packed on
                            # the leading 'parallel' grid axis; B=8 fills the
                            # sublanes so output stores are unmasked.
    D, H, O = 256, 512, 128

    key = jax.random.PRNGKey(0)
    k_feat, k_w1, k_w2, k_b2, k_g, k_be = jax.random.split(key, 6)

    # Frontend (ViT1D) features, provided in bf16 (half the HBM stream); the
    # pooling accumulator inside the kernel is f32.
    feat = jax.random.normal(k_feat, (G, B, S, D),
                             dtype=jnp.float32).astype(jnp.bfloat16)

    # Parameter shapes follow the nn.Module __init__; Linear weights are
    # stored transposed vs torch (in_features, out_features) so the kernel
    # computes x @ W directly.
    w1 = jax.random.normal(k_w1, (D, H), dtype=jnp.float32) * 0.02
    gamma = 1.0 + 0.1 * jax.random.normal(k_g, (H,), dtype=jnp.float32)
    beta = 0.1 * jax.random.normal(k_be, (H,), dtype=jnp.float32)
    w2 = jax.random.normal(k_w2, (H, O), dtype=jnp.float32) * 0.02
    b2 = jax.random.normal(k_b2, (O,), dtype=jnp.float32) * 0.01

    # 1) Whole-sequence tile, both branches in one launch.
    y, z = encoder_forward(feat, w1, gamma, beta, w2, b2)
    # 2) Force small sequence tiles so the cdiv-grid + ragged-last-tile mask
    #    path is exercised (24 rows = 16 + 8 with bf16's 16-row quantum).
    y2, z2 = encoder_forward(feat, w1, gamma, beta, w2, b2, max_tile_s=16)
    # 3) Single-branch (B, S, D) input, matching encoderModel.forward exactly.
    y1, z1 = encoder_forward(feat[0], w1, gamma, beta, w2, b2)
    jax.block_until_ready((y, z, y2, z2, y1, z1))

    y_ref, z_ref = jax.vmap(
        lambda f: reference_forward(f, w1, gamma, beta, w2, b2))(feat)

    assert y.shape == (G, B, D) and z.shape == (G, B, O)
    assert y1.shape == (B, D) and z1.shape == (B, O)
    assert jnp.allclose(y, y_ref, atol=1e-5, rtol=1e-5)
    assert jnp.allclose(z, z_ref, atol=5e-3, rtol=5e-3)
    assert jnp.allclose(y2, y_ref, atol=1e-5, rtol=1e-5)
    assert jnp.allclose(z2, z_ref, atol=5e-3, rtol=5e-3)
    assert jnp.allclose(y1, y_ref[0], atol=1e-5, rtol=1e-5)
    assert jnp.allclose(z1, z_ref[0], atol=5e-3, rtol=5e-3)

    print("KERNEL_OK")
</pallas_src>

<mosaic_0001>
module attributes {stable_mosaic.version = 11 : i64} {
  func.func @encoder_kernel(%arg0: i32, %arg1: i32, %arg2: memref<1x8x24x256xbf16, #tpu.memory_space<vmem>>, %arg3: memref<256x512xf32, #tpu.memory_space<vmem>>, %arg4: memref<1x512xf32, #tpu.memory_space<vmem>>, %arg5: memref<1x512xf32, #tpu.memory_space<vmem>>, %arg6: memref<512x128xf32, #tpu.memory_space<vmem>>, %arg7: memref<1x128xf32, #tpu.memory_space<vmem>>, %arg8: memref<1x8x256xf32, #tpu.memory_space<vmem>>, %arg9: memref<1x8x128xf32, #tpu.memory_space<vmem>>, %arg10: memref<8x256xf32, #tpu.memory_space<vmem>>) attributes {dimension_semantics = [#tpu.dimension_semantics<parallel>, #tpu.dimension_semantics<arbitrary>], iteration_bounds = array<i64: 2, 1>, scalar_prefetch = 0 : i64, scratch_operands = 1 : i64, tpu.core_type = #tpu.core_type<tc>, window_params = [{transform_indices = @transform_0, window_bounds = array<i64: 1, 8, 24, 256>}, {pipeline_mode = #tpu.pipeline_mode<synchronous>, transform_indices = @transform_1, window_bounds = array<i64: 256, 512>}, {pipeline_mode = #tpu.pipeline_mode<synchronous>, transform_indices = @transform_2, window_bounds = array<i64: 1, 512>}, {pipeline_mode = #tpu.pipeline_mode<synchronous>, transform_indices = @transform_3, window_bounds = array<i64: 1, 512>}, {pipeline_mode = #tpu.pipeline_mode<synchronous>, transform_indices = @transform_4, window_bounds = array<i64: 512, 128>}, {pipeline_mode = #tpu.pipeline_mode<synchronous>, transform_indices = @transform_5, window_bounds = array<i64: 1, 128>}, {transform_indices = @transform_6, window_bounds = array<i64: 1, 8, 256>}, {transform_indices = @transform_7, window_bounds = array<i64: 1, 8, 128>}]} {
    %c0_i32 = arith.constant 0 : i32
    %0 = arith.cmpi eq, %arg1, %c0_i32 : i32
    %1 = arith.extui %0 : i1 to i32
    %c0_i32_0 = arith.constant 0 : i32
    %2 = arith.cmpi ne, %1, %c0_i32_0 : i32
    scf.if %2 {
      %cst_10 = arith.constant 0.000000e+00 : f32
      %13 = vector.broadcast %cst_10 : f32 to vector<8x256xf32>
      %c0_11 = arith.constant 0 : index
      %c0_12 = arith.constant 0 : index
      %14 = vector.load %arg10[%c0_11, %c0_12] : memref<8x256xf32, #tpu.memory_space<vmem>>, vector<8x256xf32>
      tpu.vector_store %arg10[%c0_11, %c0_12], %13 {strides = array<i32>} : memref<8x256xf32, #tpu.memory_space<vmem>>, vector<8x256xf32>,
    } else {
    }
    %c0 = arith.constant 0 : index
    %c0_1 = arith.constant 0 : index
    %c0_2 = arith.constant 0 : index
    %c0_3 = arith.constant 0 : index
    %3 = vector.load %arg2[%c0, %c0_1, %c0_2, %c0_3] : memref<1x8x24x256xbf16, #tpu.memory_space<vmem>>, vector<1x8x24x256xbf16>
    %4 = vector.shape_cast %3 : vector<1x8x24x256xbf16> to vector<8x24x256xbf16>
    %c0_4 = arith.constant 0 : index
    %c0_5 = arith.constant 0 : index
    %5 = vector.load %arg10[%c0_4, %c0_5] : memref<8x256xf32, #tpu.memory_space<vmem>>, vector<8x256xf32>
    %6 = arith.extf %4 : vector<8x24x256xbf16> to vector<8x24x256xf32>
    %cst = arith.constant dense<0.000000e+00> : vector<8x256xf32>
    %7 = vector.multi_reduction <add>, %6, %cst [1] : vector<8x24x256xf32> to vector<8x256xf32>
    %8 = arith.addf %5, %7 : vector<8x256xf32>
    %c0_6 = arith.constant 0 : index
    %c0_7 = arith.constant 0 : index
    %9 = vector.load %arg10[%c0_6, %c0_7] : memref<8x256xf32, #tpu.memory_space<vmem>>, vector<8x256xf32>
    tpu.vector_store %arg10[%c0_6, %c0_7], %8 {strides = array<i32>} : memref<8x256xf32, #tpu.memory_space<vmem>>, vector<8x256xf32>,
    %c0_i32_8 = arith.constant 0 : i32
    %10 = arith.cmpi eq, %arg1, %c0_i32_8 : i32
    %11 = arith.extui %10 : i1 to i32
    %c0_i32_9 = arith.constant 0 : i32
    %12 = arith.cmpi ne, %11, %c0_i32_9 : i32
    scf.if %12 {
      %c0_10 = arith.constant 0 : index
      %c0_11 = arith.constant 0 : index
      %13 = vector.load %arg10[%c0_10, %c0_11] : memref<8x256xf32, #tpu.memory_space<vmem>>, vector<8x256xf32>
      %cst_12 = arith.constant 0.0416666679 : f32
      %14 = vector.broadcast %cst_12 : f32 to vector<8x256xf32>
      %15 = arith.mulf %13, %14 : vector<8x256xf32>
      %c0_13 = arith.constant 0 : index
      %c0_14 = arith.constant 0 : index
      %c0_15 = arith.constant 0 : index
      %16 = vector.load %arg8[%c0_13, %c0_14, %c0_15] : memref<1x8x256xf32, #tpu.memory_space<vmem>>, vector<1x8x256xf32>
      %17 = vector.shape_cast %16 : vector<1x8x256xf32> to vector<8x256xf32>
      %18 = vector.shape_cast %15 : vector<8x256xf32> to vector<1x8x256xf32>
      tpu.vector_store %arg8[%c0_13, %c0_14, %c0_15], %18 {strides = array<i32>} : memref<1x8x256xf32, #tpu.memory_space<vmem>>, vector<1x8x256xf32>,
      %c0_16 = arith.constant 0 : index
      %c0_17 = arith.constant 0 : index
      %19 = vector.load %arg3[%c0_16, %c0_17] : memref<256x512xf32, #tpu.memory_space<vmem>>, vector<256x512xf32>
      %cst_18 = arith.constant dense<0.000000e+00> : vector<8x512xf32>
      %20 = tpu.matmul %15, %19, %cst_18 {dimension_numbers = #tpu.dot_dimension_numbers<[1], [0], [0], [1], [0, 0, 1, 1], [], []>} : vector<8x256xf32>, vector<256x512xf32>, vector<8x512xf32> -> vector<8x512xf32>
      %cst_19 = arith.constant dense<0.000000e+00> : vector<512xf32>
      %21 = vector.multi_reduction <add>, %20, %cst_19 [0] : vector<8x512xf32> to vector<512xf32>
      %22 = vector.shape_cast %21 : vector<512xf32> to vector<1x512xf32>
      %cst_20 = arith.constant 1.250000e-01 : f32
      %23 = vector.broadcast %cst_20 : f32 to vector<1x512xf32>
      %24 = arith.mulf %22, %23 : vector<1x512xf32>
      %25 = vector.broadcast %24 : vector<1x512xf32> to vector<8x512xf32>
      %26 = arith.subf %20, %25 : vector<8x512xf32>
      %27 = arith.mulf %26, %26 : vector<8x512xf32>
      %cst_21 = arith.constant dense<0.000000e+00> : vector<512xf32>
      %28 = vector.multi_reduction <add>, %27, %cst_21 [0] : vector<8x512xf32> to vector<512xf32>
      %29 = vector.shape_cast %28 : vector<512xf32> to vector<1x512xf32>
      %cst_22 = arith.constant 1.250000e-01 : f32
      %30 = vector.broadcast %cst_22 : f32 to vector<1x512xf32>
      %31 = arith.mulf %29, %30 : vector<1x512xf32>
      %c0_23 = arith.constant 0 : index
      %c0_24 = arith.constant 0 : index
      %32 = vector.load %arg4[%c0_23, %c0_24] : memref<1x512xf32, #tpu.memory_space<vmem>>, vector<1x512xf32>
      %cst_25 = arith.constant 9.99999974E-6 : f32
      %33 = vector.broadcast %cst_25 : f32 to vector<1x512xf32>
      %34 = arith.addf %31, %33 : vector<1x512xf32>
      %35 = math.rsqrt %34 : vector<1x512xf32>
      %36 = arith.mulf %32, %35 : vector<1x512xf32>
      %c0_26 = arith.constant 0 : index
      %c0_27 = arith.constant 0 : index
      %37 = vector.load %arg5[%c0_26, %c0_27] : memref<1x512xf32, #tpu.memory_space<vmem>>, vector<1x512xf32>
      %38 = arith.mulf %24, %36 : vector<1x512xf32>
      %39 = arith.subf %37, %38 : vector<1x512xf32>
      %40 = vector.broadcast %36 : vector<1x512xf32> to vector<8x512xf32>
      %41 = arith.mulf %20, %40 : vector<8x512xf32>
      %42 = vector.broadcast %39 : vector<1x512xf32> to vector<8x512xf32>
      %43 = arith.addf %41, %42 : vector<8x512xf32>
      %cst_28 = arith.constant 0.000000e+00 : f32
      %44 = vector.broadcast %cst_28 : f32 to vector<8x512xf32>
      %45 = arith.maximumf %43, %44 : vector<8x512xf32>
      %c0_29 = arith.constant 0 : index
      %c0_30 = arith.constant 0 : index
      %46 = vector.load %arg6[%c0_29, %c0_30] : memref<512x128xf32, #tpu.memory_space<vmem>>, vector<512x128xf32>
      %cst_31 = arith.constant dense<0.000000e+00> : vector<8x128xf32>
      %47 = tpu.matmul %45, %46, %cst_31 {dimension_numbers = #tpu.dot_dimension_numbers<[1], [0], [0], [1], [0, 0, 1, 1], [], []>} : vector<8x512xf32>, vector<512x128xf32>, vector<8x128xf32> -> vector<8x128xf32>
      %c0_32 = arith.constant 0 : index
      %c0_33 = arith.constant 0 : index
      %48 = vector.load %arg7[%c0_32, %c0_33] : memref<1x128xf32, #tpu.memory_space<vmem>>, vector<1x128xf32>
      %49 = vector.broadcast %48 : vector<1x128xf32> to vector<8x128xf32>
      %50 = arith.addf %47, %49 : vector<8x128xf32>
      %c0_34 = arith.constant 0 : index
      %c0_35 = arith.constant 0 : index
      %c0_36 = arith.constant 0 : index
      %51 = vector.load %arg9[%c0_34, %c0_35, %c0_36] : memref<1x8x128xf32, #tpu.memory_space<vmem>>, vector<1x8x128xf32>
      %52 = vector.shape_cast %51 : vector<1x8x128xf32> to vector<8x128xf32>
      %53 = vector.shape_cast %50 : vector<8x128xf32> to vector<1x8x128xf32>
      tpu.vector_store %arg9[%c0_34, %c0_35, %c0_36], %53 {strides = array<i32>} : memref<1x8x128xf32, #tpu.memory_space<vmem>>, vector<1x8x128xf32>,
    } else {
    }
    return
  }
  func.func @transform_0(%arg0: i32, %arg1: i32) -> (i32, i32, i32, i32) {
    %c0_i32 = arith.constant 0 : i32
    %c0_i32_0 = arith.constant 0 : i32
    %c0_i32_1 = arith.constant 0 : i32
    return %arg0, %c0_i32, %arg1, %c0_i32_0 : i32, i32, i32, i32
  }
  func.func @transform_1(%arg0: i32, %arg1: i32) -> (i32, i32) {
    %c0_i32 = arith.constant 0 : i32
    %c0_i32_0 = arith.constant 0 : i32
    %c0_i32_1 = arith.constant 0 : i32
    return %c0_i32, %c0_i32_0 : i32, i32
  }
  func.func @transform_2(%arg0: i32, %arg1: i32) -> (i32, i32) {
    %c0_i32 = arith.constant 0 : i32
    %c0_i32_0 = arith.constant 0 : i32
    %c0_i32_1 = arith.constant 0 : i32
    return %c0_i32, %c0_i32_0 : i32, i32
  }
  func.func @transform_3(%arg0: i32, %arg1: i32) -> (i32, i32) {
    %c0_i32 = arith.constant 0 : i32
    %c0_i32_0 = arith.constant 0 : i32
    %c0_i32_1 = arith.constant 0 : i32
    return %c0_i32, %c0_i32_0 : i32, i32
  }
  func.func @transform_4(%arg0: i32, %arg1: i32) -> (i32, i32) {
    %c0_i32 = arith.constant 0 : i32
    %c0_i32_0 = arith.constant 0 : i32
    %c0_i32_1 = arith.constant 0 : i32
    return %c0_i32, %c0_i32_0 : i32, i32
  }
  func.func @transform_5(%arg0: i32, %arg1: i32) -> (i32, i32) {
    %c0_i32 = arith.constant 0 : i32
    %c0_i32_0 = arith.constant 0 : i32
    %c0_i32_1 = arith.constant 0 : i32
    return %c0_i32, %c0_i32_0 : i32, i32
  }
  func.func @transform_6(%arg0: i32, %arg1: i32) -> (i32, i32, i32) {
    %c0_i32 = arith.constant 0 : i32
    %c0_i32_0 = arith.constant 0 : i32
    %c0_i32_1 = arith.constant 0 : i32
    return %arg0, %c0_i32, %c0_i32_0 : i32, i32, i32
  }
  func.func @transform_7(%arg0: i32, %arg1: i32) -> (i32, i32, i32) {
    %c0_i32 = arith.constant 0 : i32
    %c0_i32_0 = arith.constant 0 : i32
    %c0_i32_1 = arith.constant 0 : i32
    return %arg0, %c0_i32, %c0_i32_0 : i32, i32, i32
  }
}

</mosaic_0001>

<bundles_post_ra>
// kernel: tpu_custom_call.1
= control target key start
LH: loop header
LB: loop body
LE: loop exit
PB: predicated region body
PF: predicated region fallthrough
CT: control target
= control target key end

     0   :  { %s2391_s0 = inlined_call_operand.hbm [shape: bf16[2,8,24,256], index: 0, kind: input, shape index: {}]   ;;  %s2392_s1 = inlined_call_operand.hbm [shape: f32[256,512], index: 1, kind: input, shape index: {}]   ;;  %s2393_s2 = inlined_call_operand.hbm [shape: f32[1,512], index: 2, kind: input, shape index: {}]   ;;  %s2394_s3 = inlined_call_operand.hbm [shape: f32[1,512], index: 3, kind: input, shape index: {}]   ;;  %s2395_s4 = inlined_call_operand.hbm [shape: f32[512,128], index: 4, kind: input, shape index: {}]   ;;  %s2396_s5 = inlined_call_operand.vmem [shape: f32[1,128], index: 5, kind: input, shape index: {}]   ;;  %s2397_s6 = inlined_call_operand.hbm [shape: f32[2,8,256], index: 6, kind: output, shape index: {0}]   ;;  %s2398_s7 = inlined_call_operand.hbm [shape: f32[2,8,128], index: 7, kind: output, shape index: {1}]  }
   0x1   :  { %2401 = sst [smem:[#allocation20_spill]] %s2392_s1 }
   0x2   :  { %2402 = sst [smem:[#allocation21_spill]] %s2393_s2 }
   0x3   :  { %2403 = sst [smem:[#allocation22_spill]] %s2394_s3 }
   0x4   :  { %2404 = sst [smem:[#allocation23_spill]] %s2395_s4 }
   0x5   :  { %13 = vsyncpa [#allocation4], 0 }
   0x6   :  { %15 = vsyncpa [#allocation4 + $0x1], 0 }
   0x7   :  { %16 = vsyncpa [#allocation7], 0 }
   0x8   :  { %17 = vsyncpa [#allocation10], 0 }
   0x9   :  { %18 = vsyncpa [#allocation5], 0 }
   0xa   :  { %20 = vsyncpa [#allocation5 + $0x1], 0 }
   0xb   :  { %21 = vsyncpa [#allocation14], 0 }
   0xc   :  { %23 = vsyncpa [#allocation14 + $0x1], 0  ;;  %s1915_s24 = smov 0   ;;  %s1917_s25 = smov 0  }
   0xd   :  { %s1919_s26 = smov 0   ;;  %s1921_s27 = smov 0  }
   0xe   :  { %s1923_s28 = smov 0   ;;  %s1925_s29 = smov 0  }
   0xf LB: > { %s1445_s30 = sadd.s32 4294967295, %s1865_s29   ;;  %s1446_s8 = sadd.s32 4294967294, %s1865_s29   ;;  %s1865_s29 = sphi %s1925_s29, %s29_s29   ;;  %s1861_s28 = sphi %s1923_s28, %s2429_s28   ;;  %s1857_s27 = sphi %s1921_s27, %s2428_s27   ;;  %s1853_s26 = sphi %s1919_s26, %s2427_s26   ;;  %s1849_s25 = sphi %s1917_s25, %s2426_s25   ;;  %s1845_s24 = sphi %s1915_s24, %s2425_s24  }
  0x10   : > { %p63_p0 = scmp.ne.s32.totalorder %s1849_s25, %s1845_s24  ;;  %p1949_p1 = scmp.eq.s32.totalorder %s1445_s30, 0 }
  0x11   : > { %p1953_p2 = scmp.eq.s32.totalorder %s1445_s30, 1  ;;  %p198_p3 = scmp.eq.s32.totalorder %s1446_s8, 1 }
  0x12   : > { %p1959_p4 = por %p1949_p1, %p63_p0  ;;  %p1447_p5 = scmp.ge.s32.totalorder %s1865_s29, 1 }
  0x13   : > { %p1964_p6 = por %p198_p3, %p63_p0  ;;  %p231_p7 = scmp.lt.s32.totalorder %s1865_s29, 3 }
  0x14   : > { %s2409_s1 = sld [smem:[#allocation20_spill]]  ;;  %s1867_s17 = smov [#allocation6]  }
  0x15   : > { %p1972_p8 = pnand %p1447_p5, %p231_p7  ;;  %s244_s18 = sshll.u32 %s1867_s17, 4  ;;  %s245_s18 = int_to_ptr.vmem [resolvable:$true] %s244_s18 }
  0x16   : > { %p1452_p11 = scmp.ge.s32.totalorder %s1865_s29, 2  ;;  %s2412_s3 = sld [smem:[#allocation22_spill]] }
  0x17   : > { %p1494_p9 = pneg %p1972_p8  ;;  %s1868_s23 = smov 512  }
  0x18   : > { %s1869_s30 = smov 32   ;;  %s1870_s8 = smov [#allocation9]  }
  0x19   : > { %p1980_p10 = pnand %p1494_p9, %p1949_p1  ;;  %s271_s13 = sshll.u32 %s1870_s8, 4  ;;  %s272_s13 = int_to_ptr.vmem [resolvable:$true] %s271_s13 }
  0x1a   : > { %s242_s15 = sshll.u32 %s2409_s1, 4  ;;  %s2413_s2 = sld [smem:[#allocation21_spill]]  ;;  %s243_s15 = int_to_ptr.hbm [resolvable:$true] %s242_s15 }
  0x1b   : > { %1497 = dma.hbm_to_vmem [thread:$0]  (!%p1980_p10), %s243_s15, 16384, %s245_s18, [#allocation7], %s1868_s23, %s1868_s23, %s1869_s30  }
  0x1c   : > { %s269_s22 = sshll.u32 %s2412_s3, 4  ;;  %s2414_s4 = sld [smem:[#allocation23_spill]]  ;;  %s270_s22 = int_to_ptr.hbm [resolvable:$true] %s269_s22 }
  0x1d   : > { %1503 = dma.hbm_to_vmem [thread:$0]  (!%p1980_p10), %s270_s22, 64, %s272_s13, [#allocation10]  }
  0x1e   : > { %s1871_s15 = smov [#allocation8]   ;;  %s1872_s23 = smov [#allocation11]  }
  0x1f   : > { %s259_s18 = sshll.u32 %s1871_s15, 4  ;;  %s282_s30 = sshll.u32 %s1872_s23, 4  ;;  %s260_s18 = int_to_ptr.vmem [resolvable:$true] %s259_s18  ;;  %s283_s30 = int_to_ptr.vmem [resolvable:$true] %s282_s30 }
  0x20   : > { %s257_s1 = sshll.u32 %s2413_s2, 4  ;;  %s2399_s22 = smov 128   ;;  %s258_s1 = int_to_ptr.hbm [resolvable:$true] %s257_s1 }
  0x21   : > { %1500 = dma.hbm_to_vmem [thread:$0]  (!%p1980_p10), %s258_s1, 64, %s260_s18, [#allocation7]  }
  0x22   : > { %s280_s3 = sshll.u32 %s2414_s4, 4  ;;  %s2400_s8 = smov 8   ;;  %s281_s3 = int_to_ptr.hbm [resolvable:$true] %s280_s3 }
  0x23   : > { %1506 = dma.hbm_to_vmem [thread:$0]  (!%p1980_p10), %s281_s3, 8192, %s283_s30, [#allocation10], %s2399_s22, %s2399_s22, %s2400_s8  }
  0x24   : > { %s41_s13 = sadd.s32 1, %s1861_s28  ;;  %s50_s14 = sadd.s32 1, %s1853_s26 }
  0x25   : > { %p43_p12 = scmp.ge.s32.totalorder %s41_s13, 2  ;;  %p57_p13 = scmp.ne.s32.totalorder %s1853_s26, %s1849_s25 }
  0x26   : > { %p58_p0 = scmp.eq.s32.totalorder %s1865_s29, 0  ;;  %p1522_p3 = scmp.lt.s32.totalorder %s1865_s29, 2 }
  0x27   : > { %s2431_s13 = smov (%p43_p12, %s41_s13), 0  ;;  %p2015_p7 = por %p1953_p2, %p57_p13 }
  0x28   : > { %p59_p5 = por %p58_p0, %p57_p13  ;;  %s45_s19 = ssub.s32 %s1861_s28, %s2431_s13 }
  0x29   : > { %s299_s17 = sand.u32 1, %s1853_s26   ;;  %p48_p9 = scmp.eq.s32.totalorder %s45_s19, 0 }
  0x2a   : > { %s1469_s3 = smul.u32 192, %s299_s17  ;;  %p1508_p10 = pnand %p1522_p3, %p59_p5 }
  0x2b   : > { %s2023_s20 = scalar_select %p48_p9, %s1853_s26, %s50_s14  }
  0x2c   : > { %s1470_s21 = smul.u32 192, %s1861_s28  ;;  %s303_s15 = scalar_lea.vmem [#allocation3], %s1469_s3 }
  0x2d   : > { %s314_s18 = sshll.u32 %s303_s15, 4  ;;  %s300_s8 = scalar_lea.sflag [#allocation4], %s299_s17  ;;  %s315_s18 = int_to_ptr.vmem [resolvable:$true] %s314_s18 }
  0x2e   : > { %s311_s22 = scalar_lea.hbm %s2391_s0, %s1470_s21  ;;  %s2416_s2 = smov 8  }
  0x2f   : > { %s312_s10 = sshll.u32 %s311_s22, 4  ;;  %s2417_s4 = smov 128   ;;  %s313_s10 = int_to_ptr.hbm [resolvable:$true] %s312_s10 }
  0x30   : > { %1510 = dma.hbm_to_vmem [thread:$0]  (!%p1508_p10), %s313_s10, 3072, %s315_s18, %s300_s8, %s2417_s4, %s2417_s4, %s2416_s2  }
  0x31   : > { %326 = sbr.rel (%p1972_p8) target bundleno = 499 (0x1f3), region = 44  ;;  %s2035_s14 = sand.u32 (!%p1972_p8), 1, %s1849_s25  }
  0x32   : > { %s1471_s19 = smul.u32 (!%p1972_p8), 192, %s2035_s14  ;;  %s329_s3 = scalar_lea.sflag (!%p1972_p8), [#allocation4], %s2035_s14 }
  0x34   : > { %s2039_s21 = scalar_lea.vmem (!%p1972_p8), [#allocation3], %s1471_s19 }
  0x36   : > { %1824 = dma.done.wait (%p1959_p4), %s329_s3, 3072  }
  0x37   : > { %1826 = vsyncadd (%p1959_p4), %s329_s3, 4294964224 }
  0x38   : > { %1828 = dma.done.wait (%p1949_p1), [#allocation7], 16448  }
  0x39   : > { %1830 = vsyncadd (%p1949_p1), [#allocation7], 4294950848 }
  0x3a   : > { %1832 = dma.done.wait (%p1949_p1), [#allocation10], 8256  }
  0x3b   : > { %1834 = vsyncadd (%p1949_p1), [#allocation10], 4294959040  ;;  %v710_v0 = vld [vmem:[#allocation6 + $0x1e0] sm:$0xff]  ;;  %v711_v2 = vld [vmem:[#allocation6 + $0x1e8] sm:$0xff]  ;;  %vm614_vm0 = vcmask 1041409   ;;  %vm616_vm1 = vcmask 1042434  }
  0x3c   : > { %v774_v1 = vld [vmem:[#allocation6 + $0x3e0] sm:$0xff]  ;;  %778 = vmatpush.msra.mxu0 %v710_v0  ;;  %v775_v3 = vld [vmem:[#allocation6 + $0x3e8] sm:$0xff]  ;;  %818 = vmatpush.msra.mxu2 %v711_v2  ;;  %v2060_v56 = vld [vmem:[%s2039_s21 + $0x10] sm:$0xff]  ;;  %vm618_vm2 = vcmask 1043459   ;;  %vm620_vm3 = vcmask 1044484   ;;  %vm622_vm4 = vcmask 1045509  }
  0x3d   : > { %798 = vmatpush.msra.mxu1 %v774_v1  ;;  %v706_v4 = vld [vmem:[#allocation6 + $0x1c0] sm:$0xff]  ;;  %838 = vmatpush.msra.mxu3 %v775_v3  ;;  %v707_v6 = vld [vmem:[#allocation6 + $0x1c8] sm:$0xff]  ;;  %v2063_v57 = vld [vmem:[%s2039_s21 + $0x18] sm:$0xff]  ;;  %vm624_vm5 = vcmask 1046534   ;;  %vm626_vm6 = vcmask 1047559   ;;  %s1459_s2 = sshll.u32 %s2035_s14, 4 }
  0x3e   : > { %v770_v5 = vld [vmem:[#allocation6 + $0x3c0] sm:$0xff]  ;;  %v771_v7 = vld [vmem:[#allocation6 + $0x3c8] sm:$0xff]  ;;  %779 = vmatpush.msra.mxu0 %v706_v4  ;;  %819 = vmatpush.msra.mxu2 %v707_v6  ;;  %v2076_v2 = vld [vmem:[%s2039_s21 + $0x30] sm:$0xff]  ;;  %v426_v4 = vunpack.c.l.bf16 %v2060_v56  ;;  %s1468_s4 = sshll.u32 %s1857_s27, 4  ;;  %s381_s9 = scalar_lea.vmem [#allocation12], %s1459_s2 }
  0x3f   : > { %v702_v8 = vld [vmem:[#allocation6 + $0x1a0] sm:$0xff]  ;;  %799 = vmatpush.msra.mxu1 %v770_v5  ;;  %v703_v10 = vld [vmem:[#allocation6 + $0x1a8] sm:$0xff]  ;;  %839 = vmatpush.msra.mxu3 %v771_v7  ;;  %v2079_v3 = vld [vmem:[%s2039_s21 + $0x38] sm:$0xff]  ;;  %v428_v5 = vunpack.c.l.bf16 %v2063_v57  ;;  %s1274_s22 = scalar_lea.hbm %s2397_s6, %s1468_s4  ;;  %s1276_s8 = sshll.u32 %s381_s9, 4  ;;  %s1277_s8 = int_to_ptr.vmem [resolvable:$true] %s1276_s8 }
  0x40   : > { %v766_v9 = vld [vmem:[#allocation6 + $0x3a0] sm:$0xff]  ;;  %v767_v11 = vld [vmem:[#allocation6 + $0x3a8] sm:$0xff]  ;;  %780 = vmatpush.msra.mxu0 %v702_v8  ;;  %820 = vmatpush.msra.mxu2 %v703_v10  ;;  %s1278_s17 = sshll.u32 %s1274_s22, 4  ;;  %s1258_s15 = scalar_lea.sflag [#allocation5], %s2035_s14  ;;  %s1279_s17 = int_to_ptr.hbm [resolvable:$true] %s1278_s17 }
  0x41   : > { %v698_v12 = vld [vmem:[#allocation6 + $0x180] sm:$0xff]  ;;  %800 = vmatpush.msra.mxu1 %v766_v9  ;;  %v699_v14 = vld [vmem:[#allocation6 + $0x188] sm:$0xff]  ;;  %840 = vmatpush.msra.mxu3 %v767_v11  ;;  %s1757_s18 = sshra.s32 %s1279_s17, 4  ;;  %s1763_s19 = scalar_lea.hbm %s2397_s6, 32  ;;  %s1758_s18 = int_to_ptr.hbm [resolvable:$true] %s1757_s18 }
  0x42   : > { %v762_v13 = vld [vmem:[#allocation6 + $0x380] sm:$0xff]  ;;  %v763_v15 = vld [vmem:[#allocation6 + $0x388] sm:$0xff]  ;;  %781 = vmatpush.msra.mxu0 %v698_v12  ;;  %821 = vmatpush.msra.mxu2 %v699_v14  ;;  %v2092_v12 = vld [vmem:[%s2039_s21 + $0x50] sm:$0xff]  ;;  %v434_v14 = vunpack.c.l.bf16 %v2076_v2  ;;  %s1759_s23 = scalar_lea.hbm %s1758_s18, 16  ;;  %p1764_p8 = scmp.lt.s32.totalorder %s1758_s18, %s2397_s6 }
  0x43   : > { %v694_v16 = vld [vmem:[#allocation6 + $0x160] sm:$0xff]  ;;  %801 = vmatpush.msra.mxu1 %v762_v13  ;;  %v695_v18 = vld [vmem:[#allocation6 + $0x168] sm:$0xff]  ;;  %841 = vmatpush.msra.mxu3 %v763_v15  ;;  %v436_v15 = vunpack.c.l.bf16 %v2079_v3  ;;  %p1760_p1 = scmp.ne.s32.totalorder %s1758_s18, %s1759_s23  ;;  %p1765_p12 = scmp.lt.s32.totalorder %s1763_s19, %s1759_s23 }
  0x44   : > { %v758_v17 = vld [vmem:[#allocation6 + $0x360] sm:$0xff]  ;;  %v759_v19 = vld [vmem:[#allocation6 + $0x368] sm:$0xff]  ;;  %782 = vmatpush.msra.mxu0 %v694_v16  ;;  %822 = vmatpush.msra.mxu2 %v695_v18 }
  0x45   : > { %v690_v20 = vld [vmem:[#allocation6 + $0x140] sm:$0xff]  ;;  %802 = vmatpush.msra.mxu1 %v758_v17  ;;  %v691_v22 = vld [vmem:[#allocation6 + $0x148] sm:$0xff]  ;;  %842 = vmatpush.msra.mxu3 %v759_v19  ;;  %v2098_v19 = vld [vmem:[%s2039_s21 + $0x58] sm:$0xff]  ;;  %p1761_p2 = pnand %p1760_p1, %p2015_p7  ;;  %p1766_p13 = por %p1765_p12, %p1764_p8 }
  0x46   : > { %v754_v21 = vld [vmem:[#allocation6 + $0x340] sm:$0xff]  ;;  %v755_v23 = vld [vmem:[#allocation6 + $0x348] sm:$0xff]  ;;  %783 = vmatpush.msra.mxu0 %v690_v20  ;;  %823 = vmatpush.msra.mxu2 %v691_v22 }
  0x47   : > { %v686_v24 = vld [vmem:[#allocation6 + $0x120] sm:$0xff]  ;;  %803 = vmatpush.msra.mxu1 %v754_v21  ;;  %v687_v26 = vld [vmem:[#allocation6 + $0x128] sm:$0xff]  ;;  %843 = vmatpush.msra.mxu3 %v755_v23  ;;  %p1762_p4 = pneg %p1761_p2 }
  0x48   : > { %v750_v25 = vld [vmem:[#allocation6 + $0x320] sm:$0xff]  ;;  %v751_v27 = vld [vmem:[#allocation6 + $0x328] sm:$0xff]  ;;  %784 = vmatpush.msra.mxu0 %v686_v24  ;;  %824 = vmatpush.msra.mxu2 %v687_v26  ;;  %v442_v24 = vunpack.c.l.bf16 %v2092_v12 }
  0x49   : > { %v682_v28 = vld [vmem:[#allocation6 + $0x100] sm:$0xff]  ;;  %804 = vmatpush.msra.mxu1 %v750_v25  ;;  %v683_v30 = vld [vmem:[#allocation6 + $0x108] sm:$0xff]  ;;  %844 = vmatpush.msra.mxu3 %v751_v27  ;;  %p1767_p0 = pnand %p1766_p13, %p1762_p4 }
  0x4a   : > { %v746_v29 = vld [vmem:[#allocation6 + $0x300] sm:$0xff]  ;;  %v747_v31 = vld [vmem:[#allocation6 + $0x308] sm:$0xff]  ;;  %785 = vmatpush.msra.mxu0 %v682_v28  ;;  %825 = vmatpush.msra.mxu2 %v683_v30  ;;  %v2110_v28 = vld [vmem:[%s2039_s21 + $0x70] sm:$0xff] }
  0x4b   : > { %v678_v32 = vld [vmem:[#allocation6 + $0xe0] sm:$0xff]  ;;  %805 = vmatpush.msra.mxu1 %v746_v29  ;;  %v679_v34 = vld [vmem:[#allocation6 + $0xe8] sm:$0xff]  ;;  %845 = vmatpush.msra.mxu3 %v747_v31  ;;  %v2113_v29 = vld [vmem:[%s2039_s21 + $0x78] sm:$0xff]  ;;  %v444_v31 = vunpack.c.l.bf16 %v2098_v19 }
  0x4c   : > { %v742_v33 = vld [vmem:[#allocation6 + $0x2e0] sm:$0xff]  ;;  %v743_v35 = vld [vmem:[#allocation6 + $0x2e8] sm:$0xff]  ;;  %786 = vmatpush.msra.mxu0 %v678_v32  ;;  %826 = vmatpush.msra.mxu2 %v679_v34 }
  0x4d   : > { %v674_v36 = vld [vmem:[#allocation6 + $0xc0] sm:$0xff]  ;;  %806 = vmatpush.msra.mxu1 %v742_v33  ;;  %v675_v38 = vld [vmem:[#allocation6 + $0xc8] sm:$0xff]  ;;  %846 = vmatpush.msra.mxu3 %v743_v35 }
  0x4e   : > { %v738_v37 = vld [vmem:[#allocation6 + $0x2c0] sm:$0xff]  ;;  %v739_v39 = vld [vmem:[#allocation6 + $0x2c8] sm:$0xff]  ;;  %787 = vmatpush.msra.mxu0 %v674_v36  ;;  %827 = vmatpush.msra.mxu2 %v675_v38  ;;  %v2128_v38 = vld [vmem:[%s2039_s21 + $0x98] sm:$0xff] }
  0x4f   : > { %v670_v40 = vld [vmem:[#allocation6 + $0xa0] sm:$0xff]  ;;  %v671_v42 = vld [vmem:[#allocation6 + $0xa8] sm:$0xff]  ;;  %807 = vmatpush.msra.mxu1 %v738_v37  ;;  %847 = vmatpush.msra.mxu3 %v739_v39  ;;  %v2125_v37 = vld [vmem:[%s2039_s21 + $0x90] sm:$0xff]  ;;  %v450_v39 = vunpack.c.l.bf16 %v2110_v28 }
  0x50   : > { %v734_v41 = vld [vmem:[#allocation6 + $0x2a0] sm:$0xff]  ;;  %v735_v43 = vld [vmem:[#allocation6 + $0x2a8] sm:$0xff]  ;;  %788 = vmatpush.msra.mxu0 %v670_v40  ;;  %828 = vmatpush.msra.mxu2 %v671_v42  ;;  %v452_v40 = vunpack.c.l.bf16 %v2113_v29 }
  0x51   : > { %v666_v44 = vld [vmem:[#allocation6 + $0x80] sm:$0xff]  ;;  %v667_v46 = vld [vmem:[#allocation6 + $0x88] sm:$0xff]  ;;  %808 = vmatpush.msra.mxu1 %v734_v41  ;;  %848 = vmatpush.msra.mxu3 %v735_v43 }
  0x52   : > { %v730_v45 = vld [vmem:[#allocation6 + $0x280] sm:$0xff]  ;;  %v731_v47 = vld [vmem:[#allocation6 + $0x288] sm:$0xff]  ;;  %789 = vmatpush.msra.mxu0 %v666_v44  ;;  %829 = vmatpush.msra.mxu2 %v667_v46 }
  0x53   : > { %v662_v48 = vld [vmem:[#allocation6 + $0x60] sm:$0xff]  ;;  %v663_v50 = vld [vmem:[#allocation6 + $0x68] sm:$0xff]  ;;  %809 = vmatpush.msra.mxu1 %v730_v45  ;;  %849 = vmatpush.msra.mxu3 %v731_v47  ;;  %v2140_v45 = vld [vmem:[%s2039_s21 + $0xb0] sm:$0xff]  ;;  %v458_v47 = vunpack.c.l.bf16 %v2125_v37 }
  0x54   : > { %v726_v49 = vld [vmem:[#allocation6 + $0x260] sm:$0xff]  ;;  %v727_v51 = vld [vmem:[#allocation6 + $0x268] sm:$0xff]  ;;  %790 = vmatpush.msra.mxu0 %v662_v48  ;;  %830 = vmatpush.msra.mxu2 %v663_v50  ;;  %v460_v48 = vunpack.c.l.bf16 %v2128_v38 }
  0x55   : > { %v2054_v52 = vld [vmem:[%s2039_s21] sm:$0xff]  ;;  %v2057_v53 = vld [vmem:[%s2039_s21 + $0x8] sm:$0xff]  ;;  %810 = vmatpush.msra.mxu1 %v726_v49  ;;  %850 = vmatpush.msra.mxu3 %v727_v51  ;;  %v2146_v51 = vld [vmem:[%s2039_s21 + $0xb8] sm:$0xff] }
  0x56   : > { %v658_v54 = vld [vmem:[#allocation6 + $0x40] sm:$0xff]  ;;  %v422_v59 = vunpack.c.l.bf16 %v2054_v52  ;;  %v424_v60 = vunpack.c.l.bf16 %v2057_v53  ;;  %v659_v63 = vld [vmem:[#allocation6 + $0x48] sm:$0xff] }
  0x57   : > { %v722_v55 = vld [vmem:[#allocation6 + $0x240] sm:$0xff]  ;;  %v723_v0 = vld [vmem:[#allocation6 + $0x248] sm:$0xff]  ;;  %791 = vmatpush.msra.mxu0 %v658_v54  ;;  %831 = vmatpush.msra.mxu2 %v659_v63  ;;  %v468_v63 = vunpack.c.l.bf16 %v2146_v51 }
  0x58   : > { %v2066_v58 = vld [vmem:[%s2039_s21 + $0x20] sm:$0xff]  ;;  %v2073_v1 = vld [vmem:[%s2039_s21 + $0x28] sm:$0xff]  ;;  %v470_v16 = vadd.f32 %v424_v60, %v422_v59  ;;  %811 = vmatpush.msra.mxu1 %v722_v55  ;;  %851 = vmatpush.msra.mxu3 %v723_v0  ;;  %v466_v59 = vunpack.c.l.bf16 %v2140_v45 }
  0x59   : > { %v430_v6 = vunpack.c.l.bf16 %v2066_v58  ;;  %v654_v8 = vld [vmem:[#allocation6 + $0x20] sm:$0xff]  ;;  %v2089_v11 = vld [vmem:[%s2039_s21 + $0x48] sm:$0xff]  ;;  %v432_v13 = vunpack.c.l.bf16 %v2073_v1 }
  0x5a   : > { %v718_v9 = vld [vmem:[#allocation6 + $0x220] sm:$0xff]  ;;  %v655_v17 = vld [vmem:[#allocation6 + $0x28] sm:$0xff]  ;;  %v440_v23 = vunpack.c.l.bf16 %v2089_v11  ;;  %v471_v34 = vadd.f32 %v470_v16, %v426_v4  ;;  %792 = vmatpush.msra.mxu0 %v654_v8  ;;  %v502_v4 = vadd.f32 %v436_v15, %v434_v14 }
  0x5b   : > { %v2086_v10 = vld [vmem:[%s2039_s21 + $0x40] sm:$0xff]  ;;  %v719_v18 = vld [vmem:[#allocation6 + $0x228] sm:$0xff]  ;;  %v486_v25 = vadd.f32 %v430_v6, %v428_v5  ;;  %812 = vmatpush.msra.mxu1 %v718_v9  ;;  %832 = vmatpush.msra.mxu2 %v655_v17  ;;  %v566_v17 = vadd.f32 %v460_v48, %v458_v47 }
  0x5c   : > { %v2101_v20 = vld [vmem:[%s2039_s21 + $0x60] sm:$0xff]  ;;  %v2104_v21 = vld [vmem:[%s2039_s21 + $0x68] sm:$0xff]  ;;  %v438_v22 = vunpack.c.l.bf16 %v2086_v10  ;;  %v472_v49 = vrot.slane %v471_v34, 4  ;;  %852 = vmatpush.msra.mxu3 %v719_v18  ;;  %v518_v5 = vadd.f32 %v442_v24, %v440_v23 }
  0x5d   : > { %v650_v26 = vld [vmem:[#allocation6] sm:$0xff]  ;;  %v446_v32 = vunpack.c.l.bf16 %v2101_v20  ;;  %v448_v33 = vunpack.c.l.bf16 %v2104_v21  ;;  %v651_v35 = vld [vmem:[#allocation6 + $0x8] sm:$0xff]  ;;  %v487_v42 = vadd.f32 %v486_v25, %v432_v13  ;;  %v429_v13 = vunpack.c.h.bf16 %v2063_v57 }
  0x5e   : > { %v714_v27 = vld [vmem:[#allocation6 + $0x200] sm:$0xff]  ;;  %v2122_v36 = vld [vmem:[%s2039_s21 + $0x88] sm:$0xff]  ;;  %v473_v0 = vadd.f32 %v472_v49, %v471_v34  ;;  %793 = vmatpush.msra.mxu0 %v650_v26  ;;  %833 = vmatpush.msra.mxu2 %v651_v35  ;;  %v503_v25 = vadd.f32 %v502_v4, %v438_v22  ;;  %v519_v7 = vadd.f32 %v518_v5, %v444_v31  ;;  %v431_v4 = vunpack.c.h.bf16 %v2066_v58 }
  0x5f   : > { %v2116_v30 = vld [vmem:[%s2039_s21 + $0x80] sm:$0xff]  ;;  %v2137_v44 = vld [vmem:[%s2039_s21 + $0xa8] sm:$0xff]  ;;  %v456_v46 = vunpack.c.l.bf16 %v2122_v36  ;;  %v488_v60 = vrot.slane %v487_v42, 4  ;;  %813 = vmatpush.msra.mxu1 %v714_v27  ;;  %v534_v8 = vadd.f32 %v448_v33, %v446_v32 }
  0x60   : > { %v454_v41 = vunpack.c.l.bf16 %v2116_v30  ;;  %v2134_v43 = vld [vmem:[%s2039_s21 + $0xa0] sm:$0xff]  ;;  %v715_v50 = vld [vmem:[#allocation6 + $0x208] sm:$0xff]  ;;  %v464_v55 = vunpack.c.l.bf16 %v2137_v44  ;;  %v474_v16 = vrot.slane %v473_v0, 2  ;;  %v504_v15 = vrot.slane %v503_v25, 4 }
  0x61   : > { %v462_v54 = vunpack.c.l.bf16 %v2134_v43  ;;  %v489_v6 = vadd.f32 %v488_v60, %v487_v42  ;;  %853 = vmatpush.msra.mxu3 %v715_v50  ;;  %v535_v62 = vadd.f32 %v534_v8, %v450_v39  ;;  %v520_v23 = vrot.slane %v519_v7, 4 }
  0x62   : > { %v550_v9 = vadd.f32 %v454_v41, %v452_v40  ;;  %v582_v34 = vadd.f32 %v466_v59, %v464_v55  ;;  %v475_v14 = vadd.f32 %v474_v16, %v473_v0  ;;  %v505_v35 = vadd.f32 %v504_v15, %v503_v25 }
  0x63   : > { %v490_v18 = vrot.slane %v489_v6, 2  ;;  %v567_v24 = vadd.f32 %v566_v17, %v462_v54  ;;  %v536_v27 = vrot.slane %v535_v62, 4  ;;  %v521_v41 = vadd.f32 %v520_v23, %v519_v7 }
  0x64   : > { %v551_v61 = vadd.f32 %v550_v9, %v456_v46  ;;  %v583_v33 = vadd.f32 %v582_v34, %v468_v63  ;;  %v476_v40 = vrot.slane %v475_v14, 1  ;;  %v506_v48 = vrot.slane %v505_v35, 2 }
  0x65   : > { %v491_v26 = vadd.f32 %v490_v18, %v489_v6  ;;  %v568_v42 = vrot.slane %v567_v24, 4  ;;  %v537_v31 = vadd.f32 %v536_v27, %v535_v62  ;;  %v522_v49 = vrot.slane %v521_v41, 2  ;;  %v712_v27 = vld [vmem:[#allocation6 + $0x1f0] sm:$0xff] }
  0x66   : > { %v552_v32 = vrot.slane %v551_v61, 4  ;;  %v584_v39 = vrot.slane %v583_v33, 4  ;;  %v477_v46 = vadd.f32 %v476_v40, %v475_v14  ;;  %v507_v63 = vadd.f32 %v506_v48, %v505_v35  ;;  %858 = vmatpush.msrb.mxu0 %v712_v27 }
  0x67   : > { %v492_v22 = vrot.slane %v491_v26, 1  ;;  %v569_v50 = vadd.f32 %v568_v42, %v567_v24  ;;  %v538_v55 = vrot.slane %v537_v31, 2  ;;  %v523_v0 = vadd.f32 %v522_v49, %v521_v41  ;;  %v709_v49 = vld [vmem:[#allocation6 + $0x1d8] sm:$0xff] }
  0x68   : > { %v553_v47 = vadd.f32 %v552_v32, %v551_v61  ;;  %v585_v60 = vadd.f32 %v584_v39, %v583_v33  ;;  %v508_v8 = vrot.slane %v507_v63, 1  ;;  %v433_v25 = vunpack.c.h.bf16 %v2073_v1  ;;  %v776_v32 = vld [vmem:[#allocation6 + $0x3f0] sm:$0xff]  ;;  %v713_v33 = vld [vmem:[#allocation6 + $0x1f8] sm:$0xff] }
  0x69   : > { %v493_v54 = vadd.f32 %v492_v22, %v491_v26  ;;  %v570_v7 = vrot.slane %v569_v50, 2  ;;  %v539_v62 = vadd.f32 %v538_v55, %v537_v31  ;;  %v524_v9 = vrot.slane %v523_v0, 1  ;;  %878 = vmatpush.msrb.mxu1 %v776_v32  ;;  %v777_v22 = vld [vmem:[#allocation6 + $0x3f8] sm:$0xff]  ;;  %v708_v31 = vld [vmem:[#allocation6 + $0x1d0] sm:$0xff]  ;;  %898 = vmatpush.msrb.mxu2 %v713_v33 }
  0x6a   : > { %v554_v59 = vrot.slane %v553_v47, 2  ;;  %v586_v5 = vrot.slane %v585_v60, 2  ;;  %v435_v14 = vunpack.c.h.bf16 %v2076_v2  ;;  %v509_v15 = vadd.f32 %v508_v8, %v507_v63  ;;  %918 = vmatpush.msrb.mxu3 %v777_v22  ;;  %859 = vmatpush.msrb.mxu0 %v708_v31  ;;  %v764_v8 = vld [vmem:[#allocation6 + $0x390] sm:$0xff] }
  0x6b   : > { %v615_v6 = vsel %vm614_vm0, %v493_v54, %v477_v46  ;;  %v571_v16 = vadd.f32 %v570_v7, %v569_v50  ;;  %v540_v17 = vrot.slane %v539_v62, 1  ;;  %v525_v23 = vadd.f32 %v524_v9, %v523_v0  ;;  %v773_v50 = vld [vmem:[#allocation6 + $0x3d8] sm:$0xff]  ;;  %v704_v54 = vld [vmem:[#allocation6 + $0x1b0] sm:$0xff]  ;;  %899 = vmatpush.msrb.mxu2 %v709_v49 }
  0x6c   : > { %v555_v61 = vadd.f32 %v554_v59, %v553_v47  ;;  %v587_v34 = vadd.f32 %v586_v5, %v585_v60  ;;  %v437_v26 = vunpack.c.h.bf16 %v2079_v3  ;;  %v439_v42 = vunpack.c.h.bf16 %v2086_v10  ;;  %v772_v47 = vld [vmem:[#allocation6 + $0x3d0] sm:$0xff]  ;;  %v705_v7 = vld [vmem:[#allocation6 + $0x1b8] sm:$0xff]  ;;  %919 = vmatpush.msrb.mxu3 %v773_v50  ;;  %860 = vmatpush.msrb.mxu0 %v704_v54 }
  0x6d   : > { %v572_v24 = vrot.slane %v571_v16, 1  ;;  %v541_v40 = vadd.f32 %v540_v17, %v539_v62  ;;  %v617_v46 = vsel %vm616_vm1, %v509_v15, %v615_v6  ;;  %v441_v48 = vunpack.c.h.bf16 %v2089_v11  ;;  %879 = vmatpush.msrb.mxu1 %v772_v47  ;;  %v768_v0 = vld [vmem:[#allocation6 + $0x3b0] sm:$0xff]  ;;  %v769_v62 = vld [vmem:[#allocation6 + $0x3b8] sm:$0xff]  ;;  %900 = vmatpush.msrb.mxu2 %v705_v7 }
  0x6e   : > { %v556_v18 = vrot.slane %v555_v61, 1  ;;  %v588_v41 = vrot.slane %v587_v34, 1  ;;  %v443_v3 = vunpack.c.h.bf16 %v2092_v12  ;;  %v619_v59 = vsel %vm618_vm2, %v525_v23, %v617_v46  ;;  %v700_v6 = vld [vmem:[#allocation6 + $0x190] sm:$0xff]  ;;  %v701_v17 = vld [vmem:[#allocation6 + $0x198] sm:$0xff]  ;;  %920 = vmatpush.msrb.mxu3 %v769_v62 }
  0x6f   : > { %v573_v39 = vadd.f32 %v572_v24, %v571_v16  ;;  %v445_v60 = vunpack.c.h.bf16 %v2098_v19  ;;  %v447_v63 = vunpack.c.h.bf16 %v2101_v20  ;;  %v621_v11 = vsel %vm620_vm3, %v541_v40, %v619_v59  ;;  %880 = vmatpush.msrb.mxu1 %v768_v0  ;;  %v696_v15 = vld [vmem:[#allocation6 + $0x170] sm:$0xff]  ;;  %861 = vmatpush.msrb.mxu0 %v700_v6  ;;  %v693_v47 = vld [vmem:[#allocation6 + $0x158] sm:$0xff] }
  0x70   : > { %v557_v35 = vadd.f32 %v556_v18, %v555_v61  ;;  %v589_v55 = vadd.f32 %v588_v41, %v587_v34  ;;  %v449_v12 = vunpack.c.h.bf16 %v2104_v21  ;;  %v451_v61 = vunpack.c.h.bf16 %v2110_v28  ;;  %v765_v21 = vld [vmem:[#allocation6 + $0x398] sm:$0xff]  ;;  %901 = vmatpush.msrb.mxu2 %v701_v17  ;;  %v688_v10 = vld [vmem:[#allocation6 + $0x130] sm:$0xff] }
  0x71   : > { %v453_v5 = vunpack.c.h.bf16 %v2113_v29  ;;  %v455_v20 = vunpack.c.h.bf16 %v2116_v30  ;;  %v457_v9 = vunpack.c.h.bf16 %v2122_v36  ;;  %v459_v16 = vunpack.c.h.bf16 %v2125_v37  ;;  %881 = vmatpush.msrb.mxu1 %v764_v8  ;;  %921 = vmatpush.msrb.mxu3 %v765_v21  ;;  %v761_v41 = vld [vmem:[#allocation6 + $0x378] sm:$0xff]  ;;  %v684_v62 = vld [vmem:[#allocation6 + $0x110] sm:$0xff] }
  0x72   : > { %v623_v19 = vsel %vm622_vm4, %v557_v35, %v621_v11  ;;  %v461_v29 = vunpack.c.h.bf16 %v2128_v38  ;;  %v463_v18 = vunpack.c.h.bf16 %v2134_v43  ;;  %v465_v34 = vunpack.c.h.bf16 %v2137_v44  ;;  %862 = vmatpush.msrb.mxu0 %v696_v15  ;;  %v697_v35 = vld [vmem:[#allocation6 + $0x178] sm:$0xff]  ;;  %v748_v11 = vld [vmem:[#allocation6 + $0x310] sm:$0xff] }
  0x73   : > { %v625_v28 = vsel %vm624_vm5, %v573_v39, %v623_v19  ;;  %v467_v36 = vunpack.c.h.bf16 %v2140_v45  ;;  %v469_v37 = vunpack.c.h.bf16 %v2146_v51  ;;  %v2418_v23 = vunpack.c.h.bf16 %v2054_v52  ;;  %v760_v51 = vld [vmem:[#allocation6 + $0x370] sm:$0xff]  ;;  %v757_v39 = vld [vmem:[#allocation6 + $0x358] sm:$0xff]  ;;  %902 = vmatpush.msrb.mxu2 %v697_v35  ;;  %922 = vmatpush.msrb.mxu3 %v761_v41 }
  0x74   : > { %v627_v30 = vsel %vm626_vm6, %v589_v55, %v625_v28  ;;  %v2419_v24 = vunpack.c.h.bf16 %v2057_v53  ;;  %v494_v43 = vadd.f32 %v431_v4, %v429_v13  ;;  %v510_v44 = vadd.f32 %v437_v26, %v435_v14  ;;  %v692_v4 = vld [vmem:[#allocation6 + $0x150] sm:$0xff]  ;;  %882 = vmatpush.msrb.mxu1 %v760_v51  ;;  %v689_v55 = vld [vmem:[#allocation6 + $0x138] sm:$0xff] }
  0x75   : > { %v2184_v38 = vmul.f32 0.041666668, %v627_v30  ;;  %v526_v45 = vadd.f32 %v443_v3, %v441_v48  ;;  %v2420_v52 = vunpack.c.h.bf16 %v2060_v56  ;;  %v542_v32 = vadd.f32 %v449_v12, %v447_v63  ;;  %v756_v14 = vld [vmem:[#allocation6 + $0x350] sm:$0xff]  ;;  %863 = vmatpush.msrb.mxu0 %v692_v4  ;;  %v753_v59 = vld [vmem:[#allocation6 + $0x338] sm:$0xff]  ;;  %903 = vmatpush.msrb.mxu2 %v693_v47 }
  0x76   : > { %v478_v27 = vadd.f32 %v2419_v24, %v2418_v23  ;;  %v558_v33 = vadd.f32 %v455_v20, %v453_v5  ;;  %v574_v40 = vadd.f32 %v461_v29, %v459_v16  ;;  %v495_v57 = vadd.f32 %v494_v43, %v433_v25  ;;  %883 = vmatpush.msrb.mxu1 %v756_v14  ;;  %v685_v8 = vld [vmem:[#allocation6 + $0x118] sm:$0xff]  ;;  %v680_v21 = vld [vmem:[#allocation6 + $0xf0] sm:$0xff] }
  0x77   : > { %794 = vmatmul.f32.vlgmr.msra.gmra.mxu0 %v2184_v38  ;;  %v511_v58 = vadd.f32 %v510_v44, %v439_v42  ;;  %v527_v2 = vadd.f32 %v526_v45, %v445_v60  ;;  %v590_v13 = vadd.f32 %v467_v36, %v465_v34  ;;  %v543_v26 = vadd.f32 %v542_v32, %v451_v61  ;;  %v752_v42 = vld [vmem:[#allocation6 + $0x330] sm:$0xff]  ;;  %v749_v19 = vld [vmem:[#allocation6 + $0x318] sm:$0xff] }
  0x78   : > { %v479_v53 = vadd.f32 %v478_v27, %v2420_v52  ;;  %v559_v22 = vadd.f32 %v558_v33, %v457_v9  ;;  %v575_v31 = vadd.f32 %v574_v40, %v463_v18  ;;  %834 = vmatmul.f32.vlgmr.msra.gmra.mxu2 %v2184_v38  ;;  %v496_v46 = vrot.slane %v495_v57, 4  ;;  %923 = vmatpush.msrb.mxu3 %v757_v39  ;;  %v744_v28 = vld [vmem:[#allocation6 + $0x2f0] sm:$0xff]  ;;  %v681_v30 = vld [vmem:[#allocation6 + $0xf8] sm:$0xff] }
  0x79   : > { %v512_v48 = vrot.slane %v511_v58, 4  ;;  %v528_v1 = vrot.slane %v527_v2, 4  ;;  %v591_v25 = vadd.f32 %v590_v13, %v469_v37  ;;  %v544_v49 = vrot.slane %v543_v26, 4  ;;  %864 = vmatpush.msrb.mxu0 %v688_v10  ;;  %884 = vmatpush.msrb.mxu1 %v752_v42  ;;  %v745_v36 = vld [vmem:[#allocation6 + $0x2f8] sm:$0xff]  ;;  %v676_v43 = vld [vmem:[#allocation6 + $0xd0] sm:$0xff]  ;;  %648 = vst [vmem:[%s381_s9] sm:$0xff] %v2184_v38 }
  0x7a   : > { %v480_v56 = vrot.slane %v479_v53, 4  ;;  %v560_v50 = vrot.slane %v559_v22, 4  ;;  %v576_v54 = vrot.slane %v575_v31, 4  ;;  %v497_v60 = vadd.f32 %v496_v46, %v495_v57  ;;  %904 = vmatpush.msrb.mxu2 %v689_v55  ;;  %924 = vmatpush.msrb.mxu3 %v753_v59  ;;  %v740_v44 = vld [vmem:[#allocation6 + $0x2d0] sm:$0xff]  ;;  %v677_v32 = vld [vmem:[#allocation6 + $0xd8] sm:$0xff] }
  0x7b   : > { %v513_v63 = vadd.f32 %v512_v48, %v511_v58  ;;  %v529_v0 = vadd.f32 %v528_v1, %v527_v2  ;;  %v592_v7 = vrot.slane %v591_v25, 4  ;;  %v545_v61 = vadd.f32 %v544_v49, %v543_v26  ;;  %865 = vmatpush.msrb.mxu0 %v684_v62  ;;  %885 = vmatpush.msrb.mxu1 %v748_v11  ;;  %v741_v33 = vld [vmem:[#allocation6 + $0x2d8] sm:$0xff]  ;;  %v672_v58 = vld [vmem:[#allocation6 + $0xb0] sm:$0xff] }
  0x7c   : > { %v481_v3 = vadd.f32 %v480_v56, %v479_v53  ;;  %v561_v5 = vadd.f32 %v560_v50, %v559_v22  ;;  %v577_v6 = vadd.f32 %v576_v54, %v575_v31  ;;  %v498_v20 = vrot.slane %v497_v60, 2  ;;  %905 = vmatpush.msrb.mxu2 %v685_v8  ;;  %925 = vmatpush.msrb.mxu3 %v749_v19  ;;  %v736_v2 = vld [vmem:[#allocation6 + $0x2b0] sm:$0xff]  ;;  %v673_v26 = vld [vmem:[#allocation6 + $0xb8] sm:$0xff] }
  0x7d   : > { %v514_v9 = vrot.slane %v513_v63, 2  ;;  %v530_v16 = vrot.slane %v529_v0, 2  ;;  %v593_v17 = vadd.f32 %v592_v7, %v591_v25  ;;  %v546_v18 = vrot.slane %v545_v61, 2  ;;  %866 = vmatpush.msrb.mxu0 %v680_v21  ;;  %886 = vmatpush.msrb.mxu1 %v744_v28  ;;  %v737_v22 = vld [vmem:[#allocation6 + $0x2b8] sm:$0xff]  ;;  %v668_v48 = vld [vmem:[#allocation6 + $0x90] sm:$0xff] }
  0x7e   : > { %v482_v12 = vrot.slane %v481_v3, 2  ;;  %v562_v34 = vrot.slane %v561_v5, 2  ;;  %v578_v15 = vrot.slane %v577_v6, 2  ;;  %v499_v37 = vadd.f32 %v498_v20, %v497_v60  ;;  %906 = vmatpush.msrb.mxu2 %v681_v30  ;;  %926 = vmatpush.msrb.mxu3 %v745_v36  ;;  %v732_v1 = vld [vmem:[#allocation6 + $0x290] sm:$0xff]  ;;  %v669_v10 = vld [vmem:[#allocation6 + $0x98] sm:$0xff] }
  0x7f   : > { %v515_v23 = vadd.f32 %v514_v9, %v513_v63  ;;  %v531_v24 = vadd.f32 %v530_v16, %v529_v0  ;;  %v594_v27 = vrot.slane %v593_v17, 2  ;;  %v547_v51 = vadd.f32 %v546_v18, %v545_v61  ;;  %867 = vmatpush.msrb.mxu0 %v676_v43  ;;  %887 = vmatpush.msrb.mxu1 %v740_v44  ;;  %v733_v42 = vld [vmem:[#allocation6 + $0x298] sm:$0xff]  ;;  %v664_v50 = vld [vmem:[#allocation6 + $0x70] sm:$0xff] }
  0x80   : > { %v483_v29 = vadd.f32 %v482_v12, %v481_v3  ;;  %v563_v52 = vadd.f32 %v562_v34, %v561_v5  ;;  %v579_v53 = vadd.f32 %v578_v15, %v577_v6  ;;  %v500_v40 = vrot.slane %v499_v37, 1  ;;  %907 = vmatpush.msrb.mxu2 %v677_v32  ;;  %927 = vmatpush.msrb.mxu3 %v741_v33  ;;  %v728_v54 = vld [vmem:[#allocation6 + $0x270] sm:$0xff]  ;;  %v665_v60 = vld [vmem:[#allocation6 + $0x78] sm:$0xff] }
  0x81   : > { %v516_v35 = vrot.slane %v515_v23, 1  ;;  %v532_v41 = vrot.slane %v531_v24, 1  ;;  %v595_v57 = vadd.f32 %v594_v27, %v593_v17  ;;  %v548_v4 = vrot.slane %v547_v51, 1  ;;  %868 = vmatpush.msrb.mxu0 %v672_v58  ;;  %888 = vmatpush.msrb.mxu1 %v736_v2  ;;  %v729_v63 = vld [vmem:[#allocation6 + $0x278] sm:$0xff]  ;;  %v660_v62 = vld [vmem:[#allocation6 + $0x50] sm:$0xff] }
  0x82   : > { %v484_v45 = vrot.slane %v483_v29, 1  ;;  %v564_v14 = vrot.slane %v563_v52, 1  ;;  %v580_v56 = vrot.slane %v579_v53, 1  ;;  %v501_v31 = vadd.f32 %v500_v40, %v499_v37  ;;  %908 = vmatpush.msrb.mxu2 %v673_v26  ;;  %928 = vmatpush.msrb.mxu3 %v737_v22  ;;  %v724_v11 = vld [vmem:[#allocation6 + $0x250] sm:$0xff]  ;;  %v661_v61 = vld [vmem:[#allocation6 + $0x58] sm:$0xff] }
  0x83   : > { %v517_v47 = vadd.f32 %v516_v35, %v515_v23  ;;  %v533_v39 = vadd.f32 %v532_v41, %v531_v24  ;;  %v596_v46 = vrot.slane %v595_v57, 1  ;;  %v549_v25 = vadd.f32 %v548_v4, %v547_v51  ;;  %869 = vmatpush.msrb.mxu0 %v668_v48  ;;  %889 = vmatpush.msrb.mxu1 %v732_v1  ;;  %v725_v5 = vld [vmem:[#allocation6 + $0x258] sm:$0xff]  ;;  %v656_v8 = vld [vmem:[#allocation6 + $0x30] sm:$0xff] }
  0x84   : > { %v485_v13 = vadd.f32 %v484_v45, %v483_v29  ;;  %v565_v3 = vadd.f32 %v564_v14, %v563_v52  ;;  %v581_v55 = vadd.f32 %v580_v56, %v579_v53  ;;  %909 = vmatpush.msrb.mxu2 %v669_v10  ;;  %929 = vmatpush.msrb.mxu3 %v733_v42  ;;  %v720_v19 = vld [vmem:[#allocation6 + $0x230] sm:$0xff]  ;;  %v657_v9 = vld [vmem:[#allocation6 + $0x38] sm:$0xff] }
  0x85   : > { %v597_v0 = vadd.f32 %v596_v46, %v595_v57  ;;  %870 = vmatpush.msrb.mxu0 %v664_v50  ;;  %890 = vmatpush.msrb.mxu1 %v728_v54  ;;  %v721_v16 = vld [vmem:[#allocation6 + $0x238] sm:$0xff]  ;;  %v652_v28 = vld [vmem:[#allocation6 + $0x10] sm:$0xff] }
  0x86   : > { %v628_v49 = vsel %vm614_vm0, %v501_v31, %v485_v13  ;;  %910 = vmatpush.msrb.mxu2 %v665_v60  ;;  %930 = vmatpush.msrb.mxu3 %v729_v63  ;;  %v716_v29 = vld [vmem:[#allocation6 + $0x210] sm:$0xff]  ;;  %v653_v18 = vld [vmem:[#allocation6 + $0x18] sm:$0xff] }
  0x87   : > { %v629_v59 = vsel %vm616_vm1, %v517_v47, %v628_v49  ;;  %871 = vmatpush.msrb.mxu0 %v660_v62  ;;  %891 = vmatpush.msrb.mxu1 %v724_v11  ;;  %v717_v34 = vld [vmem:[#allocation6 + $0x218] sm:$0xff] }
  0x88   : > { %v630_v7 = vsel %vm618_vm2, %v533_v39, %v629_v59  ;;  %911 = vmatpush.msrb.mxu2 %v661_v61  ;;  %931 = vmatpush.msrb.mxu3 %v725_v5 }
  0x89   : > { %v631_v12 = vsel %vm620_vm3, %v549_v25, %v630_v7  ;;  %872 = vmatpush.msrb.mxu0 %v656_v8  ;;  %892 = vmatpush.msrb.mxu1 %v720_v19  ;;  %vm1054_vm3 = vcmask 1040384  }
  0x8a   : > { %v632_v6 = vsel %vm622_vm4, %v565_v3, %v631_v12  ;;  %912 = vmatpush.msrb.mxu2 %v657_v9  ;;  %932 = vmatpush.msrb.mxu3 %v721_v16 }
  0x8b   : > { %v633_v20 = vsel %vm624_vm5, %v581_v55, %v632_v6  ;;  %873 = vmatpush.msrb.mxu0 %v652_v28  ;;  %893 = vmatpush.msrb.mxu1 %v716_v29  ;;  %vm1057_vm5 = vcmask 1041408  }
  0x8c   : > { %v634_v17 = vsel %vm626_vm6, %v597_v0, %v633_v20  ;;  %913 = vmatpush.msrb.mxu2 %v653_v18  ;;  %933 = vmatpush.msrb.mxu3 %v717_v34 }
  0x8d   : > { %v2207_v21 = vmul.f32 0.041666668, %v634_v17  ;;  %874 = vmatmul.f32.vlgmr.msrb.gmra.mxu0 %v2184_v38  ;;  %914 = vmatmul.f32.vlgmr.msrb.gmra.mxu2 %v2184_v38 }
  0x8f   : > { %814 = vmatmul.f32.vlgmr.msra.gmra.mxu1 %v2207_v21  ;;  %854 = vmatmul.f32.vlgmr.msra.gmra.mxu3 %v2207_v21  ;;  %649 = vst [vmem:[%s381_s9 + $0x8] sm:$0xff] %v2207_v21 }
  0x97   : > { %894 = vmatmul.f32.vlgmr.msrb.gmra.mxu1 %v2207_v21  ;;  %934 = vmatmul.f32.vlgmr.msrb.gmra.mxu3 %v2207_v21 }
  0xf4   : > { %v795_v15 = vpop.f32.mrf.mxu0 }
  0xfb   : > { %v835_v23 = vpop.f32.mrf.mxu2 }
 0x10a   : > { %v875_v43 = vpop.f32.mrf.mxu0 }
 0x10c   : > { %v815_v30 = vpop.f32.mrf.mxu1 }
 0x10d   : > { %v2215_v36 = vadd.f32 %v815_v30, %v795_v15 }
 0x10f   : > { %v938_v37 = vrot.slane %v2215_v36, 4 }
 0x110   : > { %v915_v41 = vpop.f32.mrf.mxu2 }
 0x111   : > { %v939_v24 = vadd.f32 %v938_v37, %v2215_v36 }
 0x112   : > { %v855_v27 = vpop.f32.mrf.mxu3 }
 0x113   : > { %v940_v44 = vrot.slane %v939_v24, 2  ;;  %v2219_v45 = vadd.f32 %v855_v27, %v835_v23 }
 0x114   : > { %v895_v51 = vpop.f32.mrf.mxu1 }
 0x115   : > { %v941_v52 = vadd.f32 %v940_v44, %v939_v24  ;;  %v944_v53 = vrot.slane %v2219_v45, 4  ;;  %v2222_v32 = vadd.f32 %v895_v51, %v875_v43 }
 0x117   : > { %v942_v33 = vrot.slane %v941_v52, 1  ;;  %v945_v40 = vadd.f32 %v944_v53, %v2219_v45  ;;  %v950_v35 = vrot.slane %v2222_v32, 4 }
 0x119   : > { %v943_v57 = vadd.f32 %v942_v33, %v941_v52  ;;  %v946_v58 = vrot.slane %v945_v40, 2  ;;  %v951_v2 = vadd.f32 %v950_v35, %v2222_v32 }
 0x11a   : > { %v935_v13 = vpop.f32.mrf.mxu3 }
 0x11b   : > { %v2227_v4 = vmul.f32 0.125, %v943_v57  ;;  %v947_v14 = vadd.f32 %v946_v58, %v945_v40  ;;  %v952_v56 = vrot.slane %v951_v2, 2  ;;  %v2229_v26 = vadd.f32 %v935_v13, %v915_v41 }
 0x11d   : > { %v966_v22 = vsub.f32 %v2215_v36, %v2227_v4  ;;  %v948_v31 = vrot.slane %v947_v14, 1  ;;  %v953_v47 = vadd.f32 %v952_v56, %v951_v2  ;;  %v956_v39 = vrot.slane %v2229_v26, 4 }
 0x11f   : > { %v970_v46 = vmul.f32 %v966_v22, %v966_v22  ;;  %v949_v48 = vadd.f32 %v948_v31, %v947_v14  ;;  %v954_v1 = vrot.slane %v953_v47, 1  ;;  %v957_v25 = vadd.f32 %v956_v39, %v2229_v26  ;;  %v1123_v22 = vld [vmem:[#allocation11 + $0x78] sm:$0xff] }
 0x120   : > { %v1139_v31 = vld [vmem:[#allocation11 + $0xf8] sm:$0xff]  ;;  %1176 = vmatpush.msra.mxu0 %v1123_v22 }
 0x121   : > { %v974_v10 = vrot.slane %v970_v46, 4  ;;  %v2235_v42 = vmul.f32 0.125, %v949_v48  ;;  %v955_v3 = vadd.f32 %v954_v1, %v953_v47  ;;  %v958_v49 = vrot.slane %v957_v25, 2  ;;  %v1155_v47 = vld [vmem:[#allocation11 + $0x178] sm:$0xff]  ;;  %1196 = vmatpush.msra.mxu1 %v1139_v31  ;;  %v1122_v48 = vld [vmem:[#allocation11 + $0x70] sm:$0xff] }
 0x122   : > { %1216 = vmatpush.msra.mxu2 %v1155_v47  ;;  %1177 = vmatpush.msra.mxu0 %v1122_v48  ;;  %v1115_v47 = vld [vmem:[#allocation11 + $0x38] sm:$0xff] }
 0x123   : > { %v975_v50 = vadd.f32 %v974_v10, %v970_v46  ;;  %v967_v54 = vsub.f32 %v2219_v45, %v2235_v42  ;;  %v2239_v55 = vmul.f32 0.125, %v955_v3  ;;  %v959_v59 = vadd.f32 %v958_v49, %v957_v25  ;;  %v1171_v46 = vld [vmem:[#allocation11 + $0x1f8] sm:$0xff]  ;;  %v1138_v3 = vld [vmem:[#allocation11 + $0xf0] sm:$0xff] }
 0x124   : > { %1236 = vmatpush.msra.mxu3 %v1171_v46  ;;  %v1154_v49 = vld [vmem:[#allocation11 + $0x170] sm:$0xff]  ;;  %1197 = vmatpush.msra.mxu1 %v1138_v3  ;;  %v1131_v46 = vld [vmem:[#allocation11 + $0xb8] sm:$0xff] }
 0x125   : > { %v976_v60 = vrot.slane %v975_v50, 2  ;;  %v971_v63 = vmul.f32 %v967_v54, %v967_v54  ;;  %v968_v0 = vsub.f32 %v2222_v32, %v2239_v55  ;;  %v960_v7 = vrot.slane %v959_v59, 1  ;;  %v1121_v54 = vld [vmem:[#allocation11 + $0x68] sm:$0xff]  ;;  %1217 = vmatpush.msra.mxu2 %v1154_v49  ;;  %v1114_v3 = vld [vmem:[#allocation11 + $0x30] sm:$0xff] }
 0x126   : > { %1178 = vmatpush.msra.mxu0 %v1121_v54  ;;  %v1130_v49 = vld [vmem:[#allocation11 + $0xb0] sm:$0xff] }
 0x127   : > { %v977_v62 = vadd.f32 %v976_v60, %v975_v50  ;;  %v980_v11 = vrot.slane %v971_v63, 4  ;;  %v972_v12 = vmul.f32 %v968_v0, %v968_v0  ;;  %v961_v61 = vadd.f32 %v960_v7, %v959_v59  ;;  %v1170_v50 = vld [vmem:[#allocation11 + $0x1f0] sm:$0xff]  ;;  %v1137_v59 = vld [vmem:[#allocation11 + $0xe8] sm:$0xff] }
 0x128   : > { %1237 = vmatpush.msra.mxu3 %v1170_v50  ;;  %v1153_v0 = vld [vmem:[#allocation11 + $0x168] sm:$0xff]  ;;  %1198 = vmatpush.msra.mxu1 %v1137_v59 }
 0x129   : > { %v978_v5 = vrot.slane %v977_v62, 1  ;;  %v981_v6 = vadd.f32 %v980_v11, %v971_v63  ;;  %v986_v8 = vrot.slane %v972_v12, 4  ;;  %v2243_v19 = vmul.f32 0.125, %v961_v61  ;;  %v1169_v7 = vld [vmem:[#allocation11 + $0x1e8] sm:$0xff]  ;;  %v1136_v11 = vld [vmem:[#allocation11 + $0xe0] sm:$0xff]  ;;  %1218 = vmatpush.msra.mxu2 %v1153_v0 }
 0x12a   : > { %v1168_v61 = vld [vmem:[#allocation11 + $0x1e0] sm:$0xff]  ;;  %1238 = vmatpush.msra.mxu3 %v1169_v7  ;;  %1199 = vmatpush.msra.mxu1 %v1136_v11  ;;  %v1129_v0 = vld [vmem:[#allocation11 + $0xa8] sm:$0xff] }
 0x12b   : > { %v979_v20 = vadd.f32 %v978_v5, %v977_v62  ;;  %v982_v9 = vrot.slane %v981_v6, 2  ;;  %v987_v16 = vadd.f32 %v986_v8, %v972_v12  ;;  %v969_v17 = vsub.f32 %v2229_v26, %v2243_v19  ;;  %v1120_v62 = vld [vmem:[#allocation11 + $0x60] sm:$0xff]  ;;  %v1119_v8 = vld [vmem:[#allocation11 + $0x58] sm:$0xff]  ;;  %v1161_v11 = vld [vmem:[#allocation11 + $0x1a8] sm:$0xff] }
 0x12c   : > { %v1152_v12 = vld [vmem:[#allocation11 + $0x160] sm:$0xff]  ;;  %1179 = vmatpush.msra.mxu0 %v1120_v62  ;;  %1239 = vmatpush.msra.mxu3 %v1168_v61  ;;  %v1145_v62 = vld [vmem:[#allocation11 + $0x128] sm:$0xff] }
 0x12d   : > { %v983_v28 = vadd.f32 %v982_v9, %v981_v6  ;;  %v988_v29 = vrot.slane %v987_v16, 2  ;;  %v973_v18 = vmul.f32 %v969_v17, %v969_v17  ;;  %v998_v34 = vmul.f32 0.125, %v979_v20  ;;  %v1135_v20 = vld [vmem:[#allocation11 + $0xd8] sm:$0xff]  ;;  %1219 = vmatpush.msra.mxu2 %v1152_v12  ;;  %v1128_v61 = vld [vmem:[#allocation11 + $0xa0] sm:$0xff] }
 0x12e   : > { %v1151_v9 = vld [vmem:[#allocation11 + $0x158] sm:$0xff]  ;;  %1180 = vmatpush.msra.mxu0 %v1119_v8  ;;  %1200 = vmatpush.msra.mxu1 %v1135_v20  ;;  %v1160_v8 = vld [vmem:[#allocation11 + $0x1a0] sm:$0xff] }
 0x12f   : > { %v984_v15 = vrot.slane %v983_v28, 1  ;;  %v989_v30 = vadd.f32 %v988_v29, %v987_v16  ;;  %v992_v37 = vrot.slane %v973_v18, 4  ;;  %v2247_v27 = vadd.f32 1e-05, %v998_v34  ;;  %v1167_v16 = vld [vmem:[#allocation11 + $0x1d8] sm:$0xff]  ;;  %v1134_v29 = vld [vmem:[#allocation11 + $0xd0] sm:$0xff]  ;;  %1220 = vmatpush.msra.mxu2 %v1151_v9 }
 0x130   : > { %v1150_v34 = vld [vmem:[#allocation11 + $0x150] sm:$0xff]  ;;  %1240 = vmatpush.msra.mxu3 %v1167_v16  ;;  %1201 = vmatpush.msra.mxu1 %v1134_v29  ;;  %v1002_v9 = vld [vmem:[#allocation8] sm:$0xf] }
 0x131   : > { %v985_v23 = vadd.f32 %v984_v15, %v983_v28  ;;  %v990_v24 = vrot.slane %v989_v30, 1  ;;  %v993_v43 = vadd.f32 %v992_v37, %v973_v18  ;;  %1585 = vrsqrt.f32 %v2247_v27  ;;  %v1118_v28 = vld [vmem:[#allocation11 + $0x50] sm:$0xff]  ;;  %1221 = vmatpush.msra.mxu2 %v1150_v34  ;;  %v1111_v16 = vld [vmem:[#allocation11 + $0x18] sm:$0xff] }
 0x132   : > { %v1166_v15 = vld [vmem:[#allocation11 + $0x1d0] sm:$0xff]  ;;  %1181 = vmatpush.msra.mxu0 %v1118_v28  ;;  %vm1013_vm13 = vweird.f32 %v2247_v27 }
 0x133   : > { %v999_v44 = vmul.f32 0.125, %v985_v23  ;;  %v991_v51 = vadd.f32 %v990_v24, %v989_v30  ;;  %v994_v52 = vrot.slane %v993_v43, 2  ;;  %v1117_v24 = vld [vmem:[#allocation11 + $0x48] sm:$0xff]  ;;  %1241 = vmatpush.msra.mxu3 %v1166_v15  ;;  %v1110_v15 = vld [vmem:[#allocation11 + $0x10] sm:$0xff] }
 0x134   : > { %1182 = vmatpush.msra.mxu0 %v1117_v24  ;;  %v1109_v24 = vld [vmem:[#allocation11 + $0x8] sm:$0xff] }
 0x135   : > { %v2249_v53 = vadd.f32 1e-05, %v999_v44  ;;  %v1000_v33 = vmul.f32 0.125, %v991_v51  ;;  %v995_v40 = vadd.f32 %v994_v52, %v993_v43  ;;  %v1133_v43 = vld [vmem:[#allocation11 + $0xc8] sm:$0xff] }
 0x136   : > { %v1149_v44 = vld [vmem:[#allocation11 + $0x148] sm:$0xff]  ;;  %1202 = vmatpush.msra.mxu1 %v1133_v43 }
 0x137   : > { %1587 = vrsqrt.f32 %v2249_v53  ;;  %v2253_v35 = vadd.f32 1e-05, %v1000_v33  ;;  %v996_v41 = vrot.slane %v995_v40, 1  ;;  %v2256_v58 = vpop.eup %1585  ;;  %v1165_v51 = vld [vmem:[#allocation11 + $0x1c8] sm:$0xff]  ;;  %vm1023_vm8 = vweird.f32 %v2249_v53  ;;  %1222 = vmatpush.msra.mxu2 %v1149_v44 }
 0x138   : > { %v1008_v1 = vmul.f32 %v2256_v58, %v2247_v27  ;;  %1242 = vmatpush.msra.mxu3 %v1165_v51  ;;  %vm1014_vm14 = vweird.f32 %v2256_v58  ;;  %v1143_v27 = vld [vmem:[#allocation11 + $0x118] sm:$0xff]  ;;  %v1125_v43 = vld [vmem:[#allocation11 + $0x88] sm:$0xff] }
 0x139   : > { %1589 = vrsqrt.f32 %v2253_v35  ;;  %v997_v57 = vadd.f32 %v996_v41, %v995_v40  ;;  %v1116_v40 = vld [vmem:[#allocation11 + $0x40] sm:$0xff]  ;;  %vm1033_vm11 = vweird.f32 %v2253_v35  ;;  %vm1015_vm4 = vmor %vm1013_vm13, %vm1014_vm14 }
 0x13a   : > { %v1009_v5 = vmul.f32 %v2256_v58, %v1008_v1  ;;  %v1132_v41 = vld [vmem:[#allocation11 + $0xc0] sm:$0xff]  ;;  %1183 = vmatpush.msra.mxu0 %v1116_v40  ;;  %v1163_v1 = vld [vmem:[#allocation11 + $0x1b8] sm:$0xff] }
 0x13b   : > { %v1001_v2 = vmul.f32 0.125, %v997_v57  ;;  %v1148_v57 = vld [vmem:[#allocation11 + $0x140] sm:$0xff]  ;;  %1203 = vmatpush.msra.mxu1 %v1132_v41 }
 0x13c   : > { %v1010_v30 = vmul.f32 0.5, %v1009_v5  ;;  %1223 = vmatpush.msra.mxu2 %v1148_v57  ;;  %1184 = vmatpush.msra.mxu0 %v1115_v47  ;;  %v1108_v41 = vld [vmem:[#allocation11] sm:$0xff] }
 0x13d   : > { %v2258_v13 = vpop.eup %1587  ;;  %v2262_v56 = vadd.f32 1e-05, %v1001_v2  ;;  %v1164_v2 = vld [vmem:[#allocation11 + $0x1c0] sm:$0xff]  ;;  %1204 = vmatpush.msra.mxu1 %v1131_v46 }
 0x13e   : > { %v1018_v14 = vmul.f32 %v2258_v13, %v2249_v53  ;;  %vm1024_vm7 = vweird.f32 %v2258_v13  ;;  %v1147_v53 = vld [vmem:[#allocation11 + $0x138] sm:$0xff]  ;;  %1243 = vmatpush.msra.mxu3 %v1164_v2  ;;  %1185 = vmatpush.msra.mxu0 %v1114_v3  ;;  %v1124_v57 = vld [vmem:[#allocation11 + $0x80] sm:$0xff] }
 0x13f   : > { %v2264_v39 = vpop.eup %1589  ;;  %1591 = vrsqrt.f32 %v2262_v56  ;;  %vm2286_vm10 = vmor %vm1023_vm8, %vm1024_vm7  ;;  %vm1043_vm0 = vweird.f32 %v2262_v56  ;;  %1224 = vmatpush.msra.mxu2 %v1147_v53  ;;  %1205 = vmatpush.msra.mxu1 %v1130_v49  ;;  %v1156_v47 = vld [vmem:[#allocation11 + $0x180] sm:$0xff] }
 0x140   : > { %v1019_v25 = vmul.f32 %v2258_v13, %v1018_v14  ;;  %v1028_v10 = vmul.f32 %v2264_v39, %v2253_v35  ;;  %v1011_v14 = vsub.f32 1.5, %v1010_v30  ;;  %vm1034_vm9 = vweird.f32 %v2264_v39  ;;  %v1146_v35 = vld [vmem:[#allocation11 + $0x130] sm:$0xff]  ;;  %1244 = vmatpush.msra.mxu3 %v1163_v1 }
 0x141   : > { %vm2299_vm15 = vmor %vm1033_vm11, %vm1034_vm9  ;;  %1225 = vmatpush.msra.mxu2 %v1146_v35  ;;  %1206 = vmatpush.msra.mxu1 %v1129_v0  ;;  %v1126_v30 = vld [vmem:[#allocation11 + $0x90] sm:$0xff] }
 0x142   : > { %v1020_v60 = vmul.f32 0.5, %v1019_v25  ;;  %v1029_v63 = vmul.f32 %v2264_v39, %v1028_v10  ;;  %v1012_v54 = vmul.f32 %v2256_v58, %v1011_v14 }
 0x143   : > { %1226 = vmatpush.msra.mxu2 %v1145_v62  ;;  %1207 = vmatpush.msra.mxu1 %v1128_v61 }
 0x144   : > { %v1030_v6 = vmul.f32 0.5, %v1029_v63  ;;  %v1021_v17 = vsub.f32 1.5, %v1020_v60  ;;  %v1113_v63 = vld [vmem:[#allocation11 + $0x28] sm:$0xff]  ;;  %v1016_v20 = vsel %vm1015_vm4, %v2256_v58, %v1012_v54 }
 0x145   : > { %v2274_v18 = vpop.eup %1591  ;;  %1186 = vmatpush.msra.mxu0 %v1113_v63 }
 0x146   : > { %v1031_v37 = vsub.f32 1.5, %v1030_v6  ;;  %v1038_v23 = vmul.f32 %v2274_v18, %v2262_v56  ;;  %v1022_v52 = vmul.f32 %v2258_v13, %v1021_v17  ;;  %vm1044_vm12 = vweird.f32 %v2274_v18  ;;  %v1144_v6 = vld [vmem:[#allocation11 + $0x120] sm:$0xff]  ;;  %v1127_v17 = vld [vmem:[#allocation11 + $0x98] sm:$0xff] }
 0x147   : > { %vm1045_vm2 = vmor %vm1043_vm0, %vm1044_vm12  ;;  %1227 = vmatpush.msra.mxu2 %v1144_v6  ;;  %1208 = vmatpush.msra.mxu1 %v1127_v17 }
 0x148   : > { %v1039_v33 = vmul.f32 %v2274_v18, %v1038_v23  ;;  %v1032_v22 = vmul.f32 %v2264_v39, %v1031_v37  ;;  %v1026_v25 = vsel %vm2286_vm10, %v2258_v13, %v1022_v52  ;;  %v1162_v13 = vld [vmem:[#allocation11 + $0x1b0] sm:$0xff]  ;;  %v1141_v52 = vld [vmem:[#allocation11 + $0x108] sm:$0xff] }
 0x149   : > { %v1051_v7 = vrot.slane %v1026_v25, 7  ;;  %1245 = vmatpush.msra.mxu3 %v1162_v13  ;;  %v1142_v37 = vld [vmem:[#allocation11 + $0x110] sm:$0xff]  ;;  %1228 = vmatpush.msra.mxu2 %v1143_v27 }
 0x14a   : > { %v1040_v31 = vmul.f32 0.5, %v1039_v33  ;;  %v1036_v59 = vsel %vm2299_vm15, %v2264_v39, %v1032_v22  ;;  %v1112_v39 = vld [vmem:[#allocation11 + $0x20] sm:$0xff]  ;;  %v1158_v23 = vld [vmem:[#allocation11 + $0x190] sm:$0xff]  ;;  %1209 = vmatpush.msra.mxu1 %v1126_v30  ;;  %v1157_v33 = vld [vmem:[#allocation11 + $0x188] sm:$0xff] }
 0x14b   : > { %v1052_v56 = vrot.slane %v1036_v59, 6  ;;  %1246 = vmatpush.msra.mxu3 %v1161_v11  ;;  %v1055_v28 = vsel %vm1054_vm3, %v1016_v20, %v1051_v7  ;;  %1187 = vmatpush.msra.mxu0 %v1112_v39 }
 0x14c   : > { %v1041_v10 = vsub.f32 1.5, %v1040_v31  ;;  %1229 = vmatpush.msra.mxu2 %v1142_v37  ;;  %1210 = vmatpush.msra.mxu1 %v1125_v43  ;;  %v1140_v31 = vld [vmem:[#allocation11 + $0x100] sm:$0xff] }
 0x14d   : > { %1247 = vmatpush.msra.mxu3 %v1160_v8  ;;  %1188 = vmatpush.msra.mxu0 %v1111_v16 }
 0x14e   : > { %v1042_v60 = vmul.f32 %v2274_v18, %v1041_v10  ;;  %1230 = vmatpush.msra.mxu2 %v1141_v52  ;;  %1211 = vmatpush.msra.mxu1 %v1124_v57 }
 0x14f   : > { %1189 = vmatpush.msra.mxu0 %v1110_v15 }
 0x150   : > { %v1046_v12 = vsel %vm1045_vm2, %v2274_v18, %v1042_v60  ;;  %v1159_v18 = vld [vmem:[#allocation11 + $0x198] sm:$0xff]  ;;  %1231 = vmatpush.msra.mxu2 %v1140_v31 }
 0x151   : > { %v1053_v5 = vrot.slane %v1046_v12, 5  ;;  %1248 = vmatpush.msra.mxu3 %v1159_v18  ;;  %1190 = vmatpush.msra.mxu0 %v1109_v24 }
 0x153   : > { %v1056_v29 = vsel %vm616_vm1, %v1052_v56, %v1053_v5  ;;  %1249 = vmatpush.msra.mxu3 %v1158_v23  ;;  %1191 = vmatpush.msra.mxu0 %v1108_v41 }
 0x154   : > { %v1058_v34 = vsel %vm1057_vm5, %v1055_v28, %v1056_v29 }
 0x155   : > { %v1060_v58 = vmul.f32 %v1058_v34, %v1002_v9  ;;  %1250 = vmatpush.msra.mxu3 %v1157_v33 }
 0x157   : > { %v1065_v44 = vperm.slane %v1060_v58, 2  ;;  %v1066_v51 = vperm.slane %v1060_v58, 3  ;;  %v1064_v40 = vperm.slane %v1060_v58, 1  ;;  %v1063_v2 = vperm.slane %v1060_v58, 0  ;;  %1251 = vmatpush.msra.mxu3 %v1156_v47 }
 0x159   : > { %v1073_v14 = vmul.f32 %v1065_v44, %v2239_v55  ;;  %v1074_v22 = vmul.f32 %v1066_v51, %v2243_v19  ;;  %v1072_v46 = vmul.f32 %v1064_v40, %v2235_v42  ;;  %v1071_v1 = vmul.f32 %v1063_v2, %v2227_v4  ;;  %v1061_v19 = vld [vmem:[#allocation9] sm:$0xf] }
 0x15a   : > { %v1090_v50 = vmul.f32 %v1066_v51, %v2229_v26  ;;  %v1087_v42 = vmul.f32 %v1063_v2, %v2215_v36  ;;  %v1088_v35 = vmul.f32 %v1064_v40, %v2219_v45  ;;  %v1089_v13 = vmul.f32 %v1065_v44, %v2222_v32 }
 0x15b   : > { %v1080_v48 = vrot.slane %v1073_v14, 6  ;;  %v1081_v53 = vrot.slane %v1074_v22, 5  ;;  %v1079_v25 = vrot.slane %v1072_v46, 7 }
 0x15d   : > { %v1083_v55 = vsel %vm616_vm1, %v1080_v48, %v1081_v53  ;;  %v1082_v10 = vsel %vm1054_vm3, %v1071_v1, %v1079_v25 }
 0x15e   : > { %v1084_v3 = vsel %vm1057_vm5, %v1082_v10, %v1083_v55 }
 0x15f   : > { %v1086_v49 = vsub.f32 %v1061_v19, %v1084_v3 }
 0x161   : > { %v1092_v54 = vperm.slane %v1086_v49, 0  ;;  %v1093_v4 = vperm.slane %v1086_v49, 1  ;;  %v1094_v59 = vperm.slane %v1086_v49, 2  ;;  %v1095_v60 = vperm.slane %v1086_v49, 3 }
 0x163   : > { %v1100_v63 = vadd.f32 %v1092_v54, %v1087_v42  ;;  %v1101_v0 = vadd.f32 %v1093_v4, %v1088_v35  ;;  %v1102_v7 = vadd.f32 %v1094_v59, %v1089_v13  ;;  %v1103_v62 = vadd.f32 %v1095_v60, %v1090_v50 }
 0x165   : > { %v1104_v11 = vmax.f32 %v1100_v63, 0.0  ;;  %v1105_v12 = vmax.f32 %v1101_v0, 0.0  ;;  %v1106_v39 = vmax.f32 %v1102_v7, 0.0  ;;  %v1107_v26 = vmax.f32 %v1103_v62, 0.0 }
 0x167   : > { %1192 = vmatmul.f32.vlgmr.msra.gmra.mxu0 %v1104_v11  ;;  %1212 = vmatmul.f32.vlgmr.msra.gmra.mxu1 %v1105_v12 }
 0x168   : > { %1232 = vmatmul.f32.vlgmr.msra.gmra.mxu2 %v1106_v39  ;;  %1252 = vmatmul.f32.vlgmr.msra.gmra.mxu3 %v1107_v26 }
 0x169   : > { %1770 = shalt.err (!%p1767_p0)
}
 0x16a   : > { %1490 = dma.vmem_to_hbm [thread:$0]  (%p2015_p7), %s1277_s8, 256, %s1279_s17, %s1258_s15   ;;  %v1584_v38 = vld [vmem:[%s2396_s5] ss:$0 sm:$0xff] }
 0x16b   : > { %s1460_s9 = sshll.u32 %s2035_s14, 3  ;;  %s1465_s11 = sshll.u32 %s1857_s27, 3 }
 0x16c   : > { %s1288_s18 = scalar_lea.hbm %s2398_s7, %s1465_s11  ;;  %s388_s23 = scalar_lea.vmem [#allocation13], %s1460_s9 }
 0x16d   : > { %s1290_s30 = sshll.u32 %s388_s23, 4  ;;  %s1292_s8 = sshll.u32 %s1288_s18, 4  ;;  %s1291_s30 = int_to_ptr.vmem [resolvable:$true] %s1290_s30  ;;  %s1293_s8 = int_to_ptr.hbm [resolvable:$true] %s1292_s8 }
 0x16e   : > { %s1263_s17 = scalar_lea.sflag [#allocation14], %s2035_s14  ;;  %s1785_s27 = sshra.s32 %s1293_s8, 4  ;;  %s1786_s27 = int_to_ptr.hbm [resolvable:$true] %s1785_s27 }
 0x16f   : > { %s1787_s15 = scalar_lea.hbm %s1786_s27, 8  ;;  %s1791_s3 = scalar_lea.hbm %s2398_s7, 16 }
 0x170   : > { %p1788_p3 = scmp.ne.s32.totalorder %s1786_s27, %s1787_s15  ;;  %p1792_p10 = scmp.lt.s32.totalorder %s1786_s27, %s2398_s7 }
 0x171   : > { %p1793_p1 = scmp.lt.s32.totalorder %s1791_s3, %s1787_s15 }
 0x172   : > { %p1789_p5 = pnand %p1788_p3, %p2015_p7 }
 0x173   : > { %p1794_p2 = por %p1793_p1, %p1792_p10 }
 0x174   : > { %p1790_p9 = pneg %p1789_p5 }
 0x176   : > { %p1795_p4 = pnand %p1794_p2, %p1790_p9 }
 0x1e4   : > { %v1193_v21 = vpop.f32.mrf.mxu0  ;;  %v1213_v45 = vpop.f32.mrf.mxu1 }
 0x1e5   : > { %v1194_v36 = vadd.f32 %v1584_v38, %v1193_v21 }
 0x1e7   : > { %v1214_v32 = vadd.f32 %v1213_v45, %v1194_v36 }
 0x1eb   : > { %v1233_v61 = vpop.f32.mrf.mxu2  ;;  %v1253_v5 = vpop.f32.mrf.mxu3 }
 0x1ec   : > { %v1234_v56 = vadd.f32 %v1233_v61, %v1214_v32 }
 0x1ee   : > { %v1254_v6 = vadd.f32 %v1253_v5, %v1234_v56 }
 0x1f0   : > { %1256 = vst [vmem:[%s388_s23] sm:$0xff] %v1254_v6 }
 0x1f1   : > { %1798 = shalt.err (!%p1795_p4)
}
 0x1f2   : > { %1491 = dma.vmem_to_hbm [thread:$0]  (%p2015_p7), %s1291_s30, 128, %s1293_s8, %s1263_s17  }
 0x1f3 PF: > { %s1304_s14 = sand.u32 1, %s1845_s24   ;;  %p1512_p8 = pnand %p1452_p11, %p1964_p6 }
 0x1f4   : > { %s1305_s4 = scalar_lea.sflag [#allocation5], %s1304_s14 }
 0x1f5   : > { %p1513_p12 = pneg %p1512_p8 }
 0x1f7   : > { %1836 = dma.done.wait (%p1513_p12), %s1305_s4, 256  }
 0x1f8   : > { %1838 = vsyncadd (%p1513_p12), %s1305_s4, 4294967040  ;;  %s1315_s9 = scalar_lea.sflag [#allocation14], %s1304_s14 }
 0x1f9   : > { %1840 = dma.done.wait (%p1513_p12), %s1315_s9, 128  }
 0x1fa   : > { %1842 = vsyncadd (%p1513_p12), %s1315_s9, 4294967168  ;;  %s29_s29 = sadd.s32 1, %s1865_s29   ;;  %s2425_s24 = smov %s1849_s25 }
 0x1fb   : > { %p26_p13 = scmp.ge.s32.totalorder %s29_s29, 4   ;;  %s2426_s25 = smov %s1853_s26 }
 0x1fc   : > { %s2427_s26 = smov %s2023_s20  ;;  %s2428_s27 = smov %s1861_s28 }
 0x1fd   : > { %s2429_s28 = smov %s2431_s13  ;;  %28 = sbr.rel (!%p26_p13) target bundleno = 15 (0xf), region = 130 }
 0x202   :  { %1321 = vsyncpa [#allocation4], 1 }
 0x203   :  { %1323 = vsyncpa [#allocation4 + $0x1], 1 }
 0x204   :  { %1324 = vsyncpa [#allocation7], 1 }
 0x205   :  { %1325 = vsyncpa [#allocation10], 1 }
 0x206   :  { %1326 = vsyncpa [#allocation5], 1 }
 0x207   :  { %1328 = vsyncpa [#allocation5 + $0x1], 1 }
 0x208   :  { %1329 = vsyncpa [#allocation14], 1 }
 0x209   :  { %1331 = vsyncpa [#allocation14 + $0x1], 1 }

</bundles_post_ra>
